<compile_context>
chip_gen: v7x
topology: tpu7x:2x2x1
jax: 0.10.0
libtpu: 0.0.40
codegen_flags: <defaults>
</compile_context>

<pallas_src>
import functools
import math

import jax
import jax.numpy as jnp
from jax import lax
from jax.experimental import pallas as pl
from jax.experimental.pallas import tpu as pltpu


def _default_vmem_limit_bytes() -> int:
    """~80% of this generation's physical VMEM (v7x ~51 MiB, v5e/v6e ~102 MiB)."""
    try:
        cap = int(pltpu.get_tpu_info().vmem_capacity_bytes)
    except Exception:
        cap = 64 * 1024 * 1024          # conservative fallback: v7x-sized VMEM
    return int(0.8 * cap)


def _seq_tile(n: int, target: int) -> int:
    """Sequence tile: prefer a lane-dense (multiple-of-128) divisor of n."""
    if n <= target:
        return n
    t = (target // 128) * 128
    while t >= 128:
        if n % t == 0:
            return t
        t -= 128
    # Fallback: largest 8-aligned divisor <= target (sub-128 lanes; for long
    # ragged sequences prefer padding n upstream instead).
    for t in range(min(target, n), 7, -1):
        if n % t == 0 and t % 8 == 0:
            return t
    return n


def _pick_b_tile(b, n, d, heads, tq, tk, hd, x_size, mm_size, vmem_limit):
    """VMEM-budget-aware batch tile; keeps grid >= 2 when b allows (v7x)."""
    # Rough per-unit-batch VMEM footprint of one grid step:
    #   x in  (double-buffered)            : 2 * n * d * x_size
    #   out   (double-buffered)            : 2 * n * d * x_size
    #   q/k/v + staged attention-out       : 4 * n * d * mm_size
    #   score/softmax intermediates (f32)  : heads * tq * (2*tk + hd + 2) * 4
    per_bt = ((4 * x_size + 4 * mm_size) * n * d
              + heads * tq * (2 * tk + hd + 2) * 4)
    weight_bytes = 4 * d * d * mm_size + d * 4     # single-buffered + bias
    budget = int(0.85 * vmem_limit) - weight_bytes - (2 << 20)   # headroom
    bt = 1
    for cand in range(min(b, 8), 0, -1):
        if b % cand == 0 and cand * per_bt <= budget:
            bt = cand
            break
    # >= 2 grid steps so dimension_semantics=("parallel",) can shard the batch
    # grid across v7x's two TensorCores.
    if b >= 2 and b // bt < 2:
        for cand in range(bt, 0, -1):
            if b % cand == 0 and b // cand >= 2:
                bt = cand
                break
    return bt


def _quantum_attention_kernel(x_ref, wq_ref, wk_ref, wv_ref, wo_ref, bo_ref,
                              o_ref, q_s, k_s, v_s, attn_s, *,
                              heads: int, dim: int, tq: int, tk: int,
                              matmul_dtype, kv_unroll):
    bt, n, _ = x_ref.shape
    hd = dim // heads
    g = bt * heads
    num_q = n // tq
    num_k = n // tk
    scale = dim ** (-0.5)  # NOTE: module scales by full dim, not head_dim.

    # ---- QKV projections: one (bt*n, d) x (d, d) MXU matmul per weight ----
    x = x_ref[...].reshape(bt * n, dim).astype(matmul_dtype)

    def project(w_ref):
        # Weights arrive already in matmul_dtype (cast once in the wrapper).
        return jnp.dot(x, w_ref[...], preferred_element_type=jnp.float32)

    q = project(wq_ref) * scale          # fold scale into q while still f32
    k = project(wk_ref)
    v = project(wv_ref)

    def to_heads(t):                      # (bt*n, d) -> (bt*heads, n, hd)
        return (t.reshape(bt, n, heads, hd).transpose(0, 2, 1, 3)
                 .reshape(g, n, hd).astype(matmul_dtype))

    q_s[...] = to_heads(q)
    k_s[...] = to_heads(k)
    v_s[...] = to_heads(v)

    # ---- flash-style attention: q tiles outer, online softmax over kv ----
    @pl.loop(0, num_q)
    def _(qi):
        q_start = pl.multiple_of(qi * tq, tq)
        if num_q == 1:
            q_blk = q_s[...]                              # (g, tq, hd)
        else:
            q_blk = q_s[:, pl.ds(q_start, tq), :]

        def kv_body(ki, carry):
            m, l, acc = carry
            if num_k == 1:
                k_blk = k_s[...]
                v_blk = v_s[...]
            else:
                k_start = pl.multiple_of(ki * tk, tk)
                k_blk = k_s[:, pl.ds(k_start, tk), :]     # (g, tk, hd)
                v_blk = v_s[:, pl.ds(k_start, tk), :]
            s = jnp.einsum('gqd,gkd->gqk', q_blk, k_blk,
                           preferred_element_type=jnp.float32)  # (g, tq, tk)
            m_new = jnp.maximum(m, s.max(axis=-1, keepdims=True))
            alpha = jnp.exp(m - m_new)
            p = jnp.exp(s - m_new)
            l_new = alpha * l + p.sum(axis=-1, keepdims=True)
            acc_new = alpha * acc + jnp.einsum(
                'gqk,gkd->gqd', p.astype(matmul_dtype), v_blk,
                preferred_element_type=jnp.float32)
            return m_new, l_new, acc_new

        m0 = jnp.full((g, tq, 1), -jnp.inf, jnp.float32)
        l0 = jnp.zeros((g, tq, 1), jnp.float32)
        a0 = jnp.zeros((g, tq, hd), jnp.float32)
        m, l, acc = lax.fori_loop(0, num_k, kv_body, (m0, l0, a0),
                                  unroll=kv_unroll)

        # Normalize with a reciprocal of the tiny (g, tq, 1) row sums (EUP),
        # then stage the tile lane-dense ((bt, tq, d)) for the hoisted
        # output projection.
        out_h = acc * pl.reciprocal(l, approx=True)              # (g, tq, hd)
        rows = (out_h.reshape(bt, heads, tq, hd).transpose(0, 2, 1, 3)
                     .reshape(bt, tq, dim).astype(matmul_dtype))
        if num_q == 1:
            attn_s[...] = rows
        else:
            attn_s[:, pl.ds(q_start, tq), :] = rows

    # ---- output projection: one (bt*n, d) x (d, d) matmul + bias per step ----
    rows_all = attn_s[...].reshape(bt * n, dim)
    o = jnp.dot(rows_all, wo_ref[...], preferred_element_type=jnp.float32)
    o = o + bo_ref[...]                              # bias broadcast, once
    o_ref[...] = o.reshape(bt, n, dim).astype(o_ref.dtype)


def quantum_attention(x, w_q, w_k, w_v, w_out, b_out, *, heads: int,
                      matmul_dtype=None, b_tile=None,
                      q_tile: int = 128, kv_tile: int = 128,
                      vmem_limit_bytes=None):
    """x: (b, n, d); w_q/w_k/w_v/w_out: (d, d); b_out: (1, d)."""
    b, n, d = x.shape
    assert d % heads == 0, "dim must be divisible by heads"
    hd = d // heads

    if matmul_dtype is None:
        # bf16 MXU inputs by default for f32 activations (f32 accumulation and
        # f32 softmax math are kept inside the kernel).
        matmul_dtype = jnp.bfloat16 if x.dtype == jnp.float32 else x.dtype
    matmul_dtype = jnp.dtype(matmul_dtype)
    mm_size = matmul_dtype.itemsize
    x_size = jnp.dtype(x.dtype).itemsize

    # Cast the weights once on the host side: halves weight HBM DMA / VMEM
    # residency and removes the per-grid-step in-kernel cast. Bias stays f32.
    w_q = w_q.astype(matmul_dtype)
    w_k = w_k.astype(matmul_dtype)
    w_v = w_v.astype(matmul_dtype)
    w_out = w_out.astype(matmul_dtype)
    b_out = b_out.astype(jnp.float32)

    if vmem_limit_bytes is None:
        vmem_limit_bytes = _default_vmem_limit_bytes()

    tq = _seq_tile(n, q_tile)
    tk = _seq_tile(n, kv_tile)
    num_k = n // tk
    kv_unroll = True if num_k <= 8 else 4

    if b_tile is None:
        b_tile = _pick_b_tile(b, n, d, heads, tq, tk, hd,
                              x_size, mm_size, vmem_limit_bytes)
    assert b % b_tile == 0

    kernel = functools.partial(_quantum_attention_kernel, heads=heads, dim=d,
                               tq=tq, tk=tk, matmul_dtype=matmul_dtype,
                               kv_unroll=kv_unroll)

    flops = (2 * b * n * d * (3 * d)          # QKV projections
             + 4 * b * heads * n * n * hd     # QK^T + PV
             + 2 * b * n * d * d)             # output projection
    bytes_accessed = (2 * b * n * d * x_size            # x in, out
                      + 4 * d * d * mm_size + d * 4)    # weights + bias
    cost = pl.CostEstimate(flops=flops,
                           transcendentals=b * heads * n * n,
                           bytes_accessed=bytes_accessed)

    def _const_spec(shape):
        # Constant block index + single buffering: weights/bias are DMA'd once
        # across the batch grid and occupy only one VMEM buffer.
        return pl.BlockSpec(shape, lambda *_: (0,) * len(shape),
                            pipeline_mode=pl.Buffered(1))

    grid_spec = pltpu.PrefetchScalarGridSpec(
        num_scalar_prefetch=0,
        grid=(b // b_tile,),
        in_specs=[
            pl.BlockSpec((b_tile, n, d), lambda i: (i, 0, 0)),   # x
            _const_spec((d, d)),                                 # w_q
            _const_spec((d, d)),                                 # w_k
            _const_spec((d, d)),                                 # w_v
            _const_spec((d, d)),                                 # w_out
            _const_spec((1, d)),                                 # b_out
        ],
        out_specs=pl.BlockSpec((b_tile, n, d), lambda i: (i, 0, 0)),
        scratch_shapes=[
            pltpu.VMEM((b_tile * heads, n, hd), matmul_dtype),   # q
            pltpu.VMEM((b_tile * heads, n, hd), matmul_dtype),   # k
            pltpu.VMEM((b_tile * heads, n, hd), matmul_dtype),   # v
            pltpu.VMEM((b_tile, n, d), matmul_dtype),            # staged attn out
        ],
    )

    return pl.pallas_call(
        kernel,
        out_shape=jax.ShapeDtypeStruct((b, n, d), x.dtype),
        grid_spec=grid_spec,
        cost_estimate=cost,
        compiler_params=pltpu.CompilerParams(
            dimension_semantics=("parallel",),
            vmem_limit_bytes=vmem_limit_bytes,
        ),
    )(x, w_q, w_k, w_v, w_out, b_out)


def quantum_attention_ref(x, w_q, w_k, w_v, w_out, b_out, *, heads: int):
    """Pure-JAX reference mirroring the PyTorch forward."""
    b, n, d = x.shape
    hd = d // heads
    scale = d ** (-0.5)

    def proj(w):
        return (x @ w).reshape(b, n, heads, hd).transpose(0, 2, 1, 3)

    q, k, v = proj(w_q), proj(w_k), proj(w_v)
    dots = jnp.einsum('bhqd,bhkd->bhqk', q, k) * scale
    attn = jax.nn.softmax(dots, axis=-1)
    out = jnp.einsum('bhqk,bhkd->bhqd', attn, v)
    out = out.transpose(0, 2, 1, 3).reshape(b, n, d)
    return out @ w_out + b_out


if __name__ == "__main__":
    # Small shapes consistent with the module: batch=2, seq=8, dim=32, heads=8.
    B, N, D, HEADS = 2, 8, 32, 8

    key = jax.random.PRNGKey(0)
    kx, kq, kk, kv, ko, kb = jax.random.split(key, 6)

    s = 1.0 / math.sqrt(D)
    x = jax.random.normal(kx, (B, N, D), dtype=jnp.float32)
    w_q = jax.random.normal(kq, (D, D), dtype=jnp.float32) * s
    w_k = jax.random.normal(kk, (D, D), dtype=jnp.float32) * s
    w_v = jax.random.normal(kv, (D, D), dtype=jnp.float32) * s
    w_out = jax.random.normal(ko, (D, D), dtype=jnp.float32) * s
    b_out = jax.random.normal(kb, (1, D), dtype=jnp.float32) * 0.01

    y_ref = quantum_attention_ref(x, w_q, w_k, w_v, w_out, b_out, heads=HEADS)

    # Default (performance) path: bf16 MXU inputs, f32 accumulation/softmax.
    y = quantum_attention(x, w_q, w_k, w_v, w_out, b_out, heads=HEADS)
    y = jax.block_until_ready(y)
    assert y.shape == (B, N, D)
    # Tolerance covers bf16 matmul inputs + the approximate EUP reciprocal.
    assert jnp.allclose(y, y_ref, atol=6e-2, rtol=6e-2), "bf16 path mismatch"

    # f32-MXU path for tight numerical parity with the PyTorch module.
    y32 = quantum_attention(x, w_q, w_k, w_v, w_out, b_out, heads=HEADS,
                            matmul_dtype=jnp.float32)
    y32 = jax.block_until_ready(y32)
    assert jnp.allclose(y32, y_ref, atol=3e-3, rtol=3e-3), "f32 path mismatch"

    print("KERNEL_OK")
</pallas_src>

<mosaic_0001>
module attributes {stable_mosaic.version = 11 : i64} {
  func.func @_quantum_attention_kernel(%arg0: i32, %arg1: memref<1x8x32xf32, #tpu.memory_space<vmem>>, %arg2: memref<32x32xbf16, #tpu.memory_space<vmem>>, %arg3: memref<32x32xbf16, #tpu.memory_space<vmem>>, %arg4: memref<32x32xbf16, #tpu.memory_space<vmem>>, %arg5: memref<32x32xbf16, #tpu.memory_space<vmem>>, %arg6: memref<1x32xf32, #tpu.memory_space<vmem>>, %arg7: memref<1x8x32xf32, #tpu.memory_space<vmem>>, %arg8: memref<8x8x4xbf16, #tpu.memory_space<vmem>>, %arg9: memref<8x8x4xbf16, #tpu.memory_space<vmem>>, %arg10: memref<8x8x4xbf16, #tpu.memory_space<vmem>>, %arg11: memref<1x8x32xbf16, #tpu.memory_space<vmem>>) attributes {dimension_semantics = [#tpu.dimension_semantics<parallel>], iteration_bounds = array<i64: 2>, scalar_prefetch = 0 : i64, scratch_operands = 4 : i64, tpu.core_type = #tpu.core_type<tc>, window_params = [{transform_indices = @transform_0, window_bounds = array<i64: 1, 8, 32>}, {pipeline_mode = #tpu.pipeline_mode<synchronous>, transform_indices = @transform_1, window_bounds = array<i64: 32, 32>}, {pipeline_mode = #tpu.pipeline_mode<synchronous>, transform_indices = @transform_2, window_bounds = array<i64: 32, 32>}, {pipeline_mode = #tpu.pipeline_mode<synchronous>, transform_indices = @transform_3, window_bounds = array<i64: 32, 32>}, {pipeline_mode = #tpu.pipeline_mode<synchronous>, transform_indices = @transform_4, window_bounds = array<i64: 32, 32>}, {pipeline_mode = #tpu.pipeline_mode<synchronous>, transform_indices = @transform_5, window_bounds = array<i64: 1, 32>}, {transform_indices = @transform_6, window_bounds = array<i64: 1, 8, 32>}]} {
    %c0 = arith.constant 0 : index
    %c0_0 = arith.constant 0 : index
    %c0_1 = arith.constant 0 : index
    %0 = vector.load %arg1[%c0, %c0_0, %c0_1] : memref<1x8x32xf32, #tpu.memory_space<vmem>>, vector<1x8x32xf32>
    %1 = vector.shape_cast %0 : vector<1x8x32xf32> to vector<8x32xf32>
    %2 = arith.truncf %1 : vector<8x32xf32> to vector<8x32xbf16>
    %c0_2 = arith.constant 0 : index
    %c0_3 = arith.constant 0 : index
    %3 = vector.load %arg2[%c0_2, %c0_3] : memref<32x32xbf16, #tpu.memory_space<vmem>>, vector<32x32xbf16>
    %cst = arith.constant dense<0.000000e+00> : vector<8x32xf32>
    %4 = tpu.matmul %2, %3, %cst {dimension_numbers = #tpu.dot_dimension_numbers<[1], [0], [0], [1], [0, 0, 1, 1], [], []>} : vector<8x32xbf16>, vector<32x32xbf16>, vector<8x32xf32> -> vector<8x32xf32>
    %cst_4 = arith.constant 0.176776692 : f32
    %5 = vector.broadcast %cst_4 : f32 to vector<8x32xf32>
    %6 = arith.mulf %4, %5 : vector<8x32xf32>
    %c0_5 = arith.constant 0 : index
    %c0_6 = arith.constant 0 : index
    %7 = vector.load %arg3[%c0_5, %c0_6] : memref<32x32xbf16, #tpu.memory_space<vmem>>, vector<32x32xbf16>
    %cst_7 = arith.constant dense<0.000000e+00> : vector<8x32xf32>
    %8 = tpu.matmul %2, %7, %cst_7 {dimension_numbers = #tpu.dot_dimension_numbers<[1], [0], [0], [1], [0, 0, 1, 1], [], []>} : vector<8x32xbf16>, vector<32x32xbf16>, vector<8x32xf32> -> vector<8x32xf32>
    %c0_8 = arith.constant 0 : index
    %c0_9 = arith.constant 0 : index
    %9 = vector.load %arg4[%c0_8, %c0_9] : memref<32x32xbf16, #tpu.memory_space<vmem>>, vector<32x32xbf16>
    %cst_10 = arith.constant dense<0.000000e+00> : vector<8x32xf32>
    %10 = tpu.matmul %2, %9, %cst_10 {dimension_numbers = #tpu.dot_dimension_numbers<[1], [0], [0], [1], [0, 0, 1, 1], [], []>} : vector<8x32xbf16>, vector<32x32xbf16>, vector<8x32xf32> -> vector<8x32xf32>
    %11 = vector.shape_cast %6 : vector<8x32xf32> to vector<1x8x8x4xf32>
    %12 = tpu.transpose %11, [0, 2, 1, 3] : vector<1x8x8x4xf32> -> vector<1x8x8x4xf32>
    %13 = vector.shape_cast %12 : vector<1x8x8x4xf32> to vector<8x8x4xf32>
    %14 = arith.truncf %13 : vector<8x8x4xf32> to vector<8x8x4xbf16>
    %c0_11 = arith.constant 0 : index
    %c0_12 = arith.constant 0 : index
    %c0_13 = arith.constant 0 : index
    %15 = vector.load %arg8[%c0_11, %c0_12, %c0_13] : memref<8x8x4xbf16, #tpu.memory_space<vmem>>, vector<8x8x4xbf16>
    tpu.vector_store %arg8[%c0_11, %c0_12, %c0_13], %14 {strides = array<i32>} : memref<8x8x4xbf16, #tpu.memory_space<vmem>>, vector<8x8x4xbf16>,
    %16 = vector.shape_cast %8 : vector<8x32xf32> to vector<1x8x8x4xf32>
    %17 = tpu.transpose %16, [0, 2, 1, 3] : vector<1x8x8x4xf32> -> vector<1x8x8x4xf32>
    %18 = vector.shape_cast %17 : vector<1x8x8x4xf32> to vector<8x8x4xf32>
    %19 = arith.truncf %18 : vector<8x8x4xf32> to vector<8x8x4xbf16>
    %c0_14 = arith.constant 0 : index
    %c0_15 = arith.constant 0 : index
    %c0_16 = arith.constant 0 : index
    %20 = vector.load %arg9[%c0_14, %c0_15, %c0_16] : memref<8x8x4xbf16, #tpu.memory_space<vmem>>, vector<8x8x4xbf16>
    tpu.vector_store %arg9[%c0_14, %c0_15, %c0_16], %19 {strides = array<i32>} : memref<8x8x4xbf16, #tpu.memory_space<vmem>>, vector<8x8x4xbf16>,
    %21 = vector.shape_cast %10 : vector<8x32xf32> to vector<1x8x8x4xf32>
    %22 = tpu.transpose %21, [0, 2, 1, 3] : vector<1x8x8x4xf32> -> vector<1x8x8x4xf32>
    %23 = vector.shape_cast %22 : vector<1x8x8x4xf32> to vector<8x8x4xf32>
    %24 = arith.truncf %23 : vector<8x8x4xf32> to vector<8x8x4xbf16>
    %c0_17 = arith.constant 0 : index
    %c0_18 = arith.constant 0 : index
    %c0_19 = arith.constant 0 : index
    %25 = vector.load %arg10[%c0_17, %c0_18, %c0_19] : memref<8x8x4xbf16, #tpu.memory_space<vmem>>, vector<8x8x4xbf16>
    tpu.vector_store %arg10[%c0_17, %c0_18, %c0_19], %24 {strides = array<i32>} : memref<8x8x4xbf16, #tpu.memory_space<vmem>>, vector<8x8x4xbf16>,
    %c0_i32 = arith.constant 0 : i32
    %c0_20 = arith.constant 0 : index
    %c0_21 = arith.constant 0 : index
    %c0_22 = arith.constant 0 : index
    %26 = vector.load %arg8[%c0_20, %c0_21, %c0_22] : memref<8x8x4xbf16, #tpu.memory_space<vmem>>, vector<8x8x4xbf16>
    %cst_23 = arith.constant 0xFF800000 : f32
    %27 = vector.broadcast %cst_23 : f32 to vector<8x8x1xf32>
    %cst_24 = arith.constant 0.000000e+00 : f32
    %28 = vector.broadcast %cst_24 : f32 to vector<8x8x1xf32>
    %cst_25 = arith.constant 0.000000e+00 : f32
    %29 = vector.broadcast %cst_25 : f32 to vector<8x8x4xf32>
    %c0_i32_26 = arith.constant 0 : i32
    %c0_27 = arith.constant 0 : index
    %c0_28 = arith.constant 0 : index
    %c0_29 = arith.constant 0 : index
    %30 = vector.load %arg9[%c0_27, %c0_28, %c0_29] : memref<8x8x4xbf16, #tpu.memory_space<vmem>>, vector<8x8x4xbf16>
    %c0_30 = arith.constant 0 : index
    %c0_31 = arith.constant 0 : index
    %c0_32 = arith.constant 0 : index
    %31 = vector.load %arg10[%c0_30, %c0_31, %c0_32] : memref<8x8x4xbf16, #tpu.memory_space<vmem>>, vector<8x8x4xbf16>
    "tpu.trace_start"() <{level = 10 : i32, message = "gqd,gkd->gqk"}> : () -> ()
    %cst_33 = arith.constant dense<0.000000e+00> : vector<8x8x8xf32>
    %32 = tpu.matmul %26, %30, %cst_33 {dimension_numbers = #tpu.dot_dimension_numbers<[2], [2], [1], [1], [0, 0, 0, 1, 1, 1], [0], [0]>} : vector<8x8x4xbf16>, vector<8x8x4xbf16>, vector<8x8x8xf32> -> vector<8x8x8xf32>
    "tpu.trace_stop"() : () -> ()
    %cst_34 = arith.constant dense<0xFF800000> : vector<8x8xf32>
    %33 = vector.multi_reduction <maximumf>, %32, %cst_34 [2] : vector<8x8x8xf32> to vector<8x8xf32>
    %34 = vector.shape_cast %33 : vector<8x8xf32> to vector<8x8x1xf32>
    %35 = arith.maximumf %27, %34 : vector<8x8x1xf32>
    %36 = arith.subf %27, %35 : vector<8x8x1xf32>
    %37 = math.exp %36 : vector<8x8x1xf32>
    %38 = vector.broadcast %35 : vector<8x8x1xf32> to vector<8x8x8xf32>
    %39 = arith.subf %32, %38 : vector<8x8x8xf32>
    %40 = math.exp %39 : vector<8x8x8xf32>
    %41 = arith.mulf %37, %28 : vector<8x8x1xf32>
    %cst_35 = arith.constant dense<0.000000e+00> : vector<8x8xf32>
    %42 = vector.multi_reduction <add>, %40, %cst_35 [2] : vector<8x8x8xf32> to vector<8x8xf32>
    %43 = vector.shape_cast %42 : vector<8x8xf32> to vector<8x8x1xf32>
    %44 = arith.addf %41, %43 : vector<8x8x1xf32>
    %45 = vector.broadcast %37 : vector<8x8x1xf32> to vector<8x8x4xf32>
    %46 = arith.mulf %45, %29 : vector<8x8x4xf32>
    %47 = arith.truncf %40 : vector<8x8x8xf32> to vector<8x8x8xbf16>
    "tpu.trace_start"() <{level = 10 : i32, message = "gqk,gkd->gqd"}> : () -> ()
    %cst_36 = arith.constant dense<0.000000e+00> : vector<8x8x4xf32>
    %48 = tpu.matmul %47, %31, %cst_36 {dimension_numbers = #tpu.dot_dimension_numbers<[2], [1], [1], [2], [0, 0, 0, 1, 1, 2], [0], [0]>} : vector<8x8x8xbf16>, vector<8x8x4xbf16>, vector<8x8x4xf32> -> vector<8x8x4xf32>
    "tpu.trace_stop"() : () -> ()
    %49 = arith.addf %46, %48 : vector<8x8x4xf32>
    %50 = tpu.reciprocal %44 {approx = true} : vector<8x8x1xf32> -> vector<8x8x1xf32>
    %51 = vector.broadcast %50 : vector<8x8x1xf32> to vector<8x8x4xf32>
    %52 = arith.mulf %49, %51 : vector<8x8x4xf32>
    %53 = vector.shape_cast %52 : vector<8x8x4xf32> to vector<1x8x8x4xf32>
    %54 = tpu.transpose %53, [0, 2, 1, 3] : vector<1x8x8x4xf32> -> vector<1x8x8x4xf32>
    %55 = vector.shape_cast %54 : vector<1x8x8x4xf32> to vector<1x8x32xf32>
    %56 = arith.truncf %55 : vector<1x8x32xf32> to vector<1x8x32xbf16>
    %c0_37 = arith.constant 0 : index
    %c0_38 = arith.constant 0 : index
    %c0_39 = arith.constant 0 : index
    %57 = vector.load %arg11[%c0_37, %c0_38, %c0_39] : memref<1x8x32xbf16, #tpu.memory_space<vmem>>, vector<1x8x32xbf16>
    tpu.vector_store %arg11[%c0_37, %c0_38, %c0_39], %56 {strides = array<i32>} : memref<1x8x32xbf16, #tpu.memory_space<vmem>>, vector<1x8x32xbf16>,
    %c0_40 = arith.constant 0 : index
    %c0_41 = arith.constant 0 : index
    %c0_42 = arith.constant 0 : index
    %58 = vector.load %arg11[%c0_40, %c0_41, %c0_42] : memref<1x8x32xbf16, #tpu.memory_space<vmem>>, vector<1x8x32xbf16>
    %59 = vector.shape_cast %58 : vector<1x8x32xbf16> to vector<8x32xbf16>
    %c0_43 = arith.constant 0 : index
    %c0_44 = arith.constant 0 : index
    %60 = vector.load %arg5[%c0_43, %c0_44] : memref<32x32xbf16, #tpu.memory_space<vmem>>, vector<32x32xbf16>
    %cst_45 = arith.constant dense<0.000000e+00> : vector<8x32xf32>
    %61 = tpu.matmul %59, %60, %cst_45 {dimension_numbers = #tpu.dot_dimension_numbers<[1], [0], [0], [1], [0, 0, 1, 1], [], []>} : vector<8x32xbf16>, vector<32x32xbf16>, vector<8x32xf32> -> vector<8x32xf32>
    %c0_46 = arith.constant 0 : index
    %c0_47 = arith.constant 0 : index
    %62 = vector.load %arg6[%c0_46, %c0_47] : memref<1x32xf32, #tpu.memory_space<vmem>>, vector<1x32xf32>
    %63 = vector.broadcast %62 : vector<1x32xf32> to vector<8x32xf32>
    %64 = arith.addf %61, %63 : vector<8x32xf32>
    %65 = vector.shape_cast %64 : vector<8x32xf32> to vector<1x8x32xf32>
    %c0_48 = arith.constant 0 : index
    %c0_49 = arith.constant 0 : index
    %c0_50 = arith.constant 0 : index
    %66 = vector.load %arg7[%c0_48, %c0_49, %c0_50] : memref<1x8x32xf32, #tpu.memory_space<vmem>>, vector<1x8x32xf32>
    tpu.vector_store %arg7[%c0_48, %c0_49, %c0_50], %65 {strides = array<i32>} : memref<1x8x32xf32, #tpu.memory_space<vmem>>, vector<1x8x32xf32>,
    return
  }
  func.func @transform_0(%arg0: i32) -> (i32, i32, i32) {
    %c0_i32 = arith.constant 0 : i32
    %c0_i32_0 = arith.constant 0 : i32
    %c0_i32_1 = arith.constant 0 : i32
    return %arg0, %c0_i32, %c0_i32_0 : i32, i32, i32
  }
  func.func @transform_1(%arg0: i32) -> (i32, i32) {
    %c0_i32 = arith.constant 0 : i32
    %c0_i32_0 = arith.constant 0 : i32
    %c0_i32_1 = arith.constant 0 : i32
    return %c0_i32, %c0_i32_0 : i32, i32
  }
  func.func @transform_2(%arg0: i32) -> (i32, i32) {
    %c0_i32 = arith.constant 0 : i32
    %c0_i32_0 = arith.constant 0 : i32
    %c0_i32_1 = arith.constant 0 : i32
    return %c0_i32, %c0_i32_0 : i32, i32
  }
  func.func @transform_3(%arg0: i32) -> (i32, i32) {
    %c0_i32 = arith.constant 0 : i32
    %c0_i32_0 = arith.constant 0 : i32
    %c0_i32_1 = arith.constant 0 : i32
    return %c0_i32, %c0_i32_0 : i32, i32
  }
  func.func @transform_4(%arg0: i32) -> (i32, i32) {
    %c0_i32 = arith.constant 0 : i32
    %c0_i32_0 = arith.constant 0 : i32
    %c0_i32_1 = arith.constant 0 : i32
    return %c0_i32, %c0_i32_0 : i32, i32
  }
  func.func @transform_5(%arg0: i32) -> (i32, i32) {
    %c0_i32 = arith.constant 0 : i32
    %c0_i32_0 = arith.constant 0 : i32
    %c0_i32_1 = arith.constant 0 : i32
    return %c0_i32, %c0_i32_0 : i32, i32
  }
  func.func @transform_6(%arg0: i32) -> (i32, i32, i32) {
    %c0_i32 = arith.constant 0 : i32
    %c0_i32_0 = arith.constant 0 : i32
    %c0_i32_1 = arith.constant 0 : i32
    return %arg0, %c0_i32, %c0_i32_0 : i32, i32, i32
  }
}

</mosaic_0001>

<bundles_post_ra>
// kernel: tpu_custom_call.1
= control target key start
LH: loop header
LB: loop body
LE: loop exit
PB: predicated region body
PF: predicated region fallthrough
CT: control target
= control target key end

     0   :  { %11 = vsyncpa [#allocation7], 0  ;;  %s4211_s0 = inlined_call_operand.hbm [shape: f32[2,8,32], index: 0, kind: input, shape index: {}]   ;;  %s4212_s1 = inlined_call_operand.hbm [shape: bf16[32,32], index: 1, kind: input, shape index: {}]   ;;  %s4213_s2 = inlined_call_operand.hbm [shape: bf16[32,32], index: 2, kind: input, shape index: {}]   ;;  %s4214_s3 = inlined_call_operand.hbm [shape: bf16[32,32], index: 3, kind: input, shape index: {}]   ;;  %s4215_s4 = inlined_call_operand.hbm [shape: bf16[32,32], index: 4, kind: input, shape index: {}]   ;;  %s4216_s5 = inlined_call_operand.vmem [shape: f32[1,32], index: 5, kind: input, shape index: {}]   ;;  %s4217_s6 = inlined_call_operand.hbm [shape: f32[2,8,32], index: 6, kind: output, shape index: {}]  }
   0x1   :  { %13 = vsyncpa [#allocation7 + $0x1], 0 }
   0x2   :  { %14 = vsyncpa [#allocation10], 0 }
   0x3   :  { %15 = vsyncpa [#allocation13], 0 }
   0x4   :  { %16 = vsyncpa [#allocation8], 0 }
   0x5   :  { %18 = vsyncpa [#allocation8 + $0x1], 0  ;;  %s3539_s21 = smov 0   ;;  %s3541_s22 = smov 0  }
   0x6   :  { %s3543_s23 = smov 0   ;;  %s3545_s24 = smov 0  }
   0x7 LB: > { %s3478_s25 = smov [#allocation9]   ;;  %s3560_s27 = sadd.s32 4294967295, %s3476_s24   ;;  %s3476_s24 = sphi %s3545_s24, %s4241_s24   ;;  %s3472_s23 = sphi %s3543_s23, %s4240_s23   ;;  %s3468_s22 = sphi %s3541_s22, %s4239_s22   ;;  %s3464_s21 = sphi %s3539_s21, %s4238_s21  }
   0x8   : > { %s198_s26 = sshll.u32 %s3478_s25, 4  ;;  %p2845_p0 = scmp.ge.s32.totalorder %s3476_s24, 1  ;;  %s3565_s26 = int_to_ptr.vmem [resolvable:$true] %s198_s26 }
   0x9   : > { %p4218_p1 = scmp.eq.s32.totalorder %s3560_s27, 0  ;;  %p186_p2 = scmp.lt.s32.totalorder %s3476_s24, 3 }
   0xa   : > { %s3479_s29 = smov [#allocation12]   ;;  %s3480_s8 = smov [#allocation11]  }
   0xb   : > { %p3567_p3 = pnand %p2845_p0, %p186_p2  ;;  %s224_s30 = sshll.u32 %s3479_s29, 4  ;;  %s3580_s30 = int_to_ptr.vmem [resolvable:$true] %s224_s30 }
   0xc   : > { %s211_s9 = sshll.u32 %s3480_s8, 4  ;;  %s3260_s12 = scalar_lea.hbm %s4212_s1, 256  ;;  %s3582_s9 = int_to_ptr.vmem [resolvable:$true] %s211_s9 }
   0xd   : > { %s4221_s28 = scalar_select %p3567_p3, 1, 0 }
   0xe   : > { %p3117_p5 = pneg %p3567_p3  ;;  %p3261_p7 = scmp.ne.s32.totalorder %s4212_s1, %s3260_s12 }
   0xf   : > { %p3267_p11 = scmp.lt.u32.totalorder %s3260_s12, %s4212_s1 }
  0x10   : > { %p3576_p6 = pnand %p3117_p5, %p4218_p1 }
  0x12   : > { %p3592_p8 = pneg %p3576_p6 }
  0x14   : > { %p3263_p9 = pnand %p3592_p8, %p3261_p7 }
  0x16   : > { %p3264_p10 = pneg %p3263_p9 }
  0x18   : > { %p3269_p12 = pnand %p3267_p11, %p3264_p10 }
  0x1a   : > { %3272 = shalt.err (!%p3269_p12)
}
  0x1b   : > { %s3273_s18 = scalar_lea.vmem %s3565_s26, 256  ;;  %p3281_p5 = scmp.lt.s32.totalorder %s3565_s26, %s3565_s26 }
  0x1c   : > { %p3274_p13 = scmp.ne.s32.totalorder %s3565_s26, %s3273_s18  ;;  %p3282_p4 = scmp.lt.s32.totalorder %s3273_s18, %s3273_s18 }
  0x1e   : > { %p3276_p0 = pnand %p3274_p13, %p3592_p8  ;;  %p3283_p7 = por %p3282_p4, %p3281_p5 }
  0x20   : > { %p3277_p2 = pneg %p3276_p0 }
  0x22   : > { %p3284_p9 = pnand %p3283_p7, %p3277_p2 }
  0x24   : > { %3287 = shalt.err (!%p3284_p9)
}
  0x25   : > { %s3481_s19 = smov 64   ;;  %s3482_s20 = smov 4  }
  0x26   : > { %3120 = dma.hbm_to_vmem [thread:$0]  (!%p3576_p6), %s4212_s1, 256, %s3565_s26, [#allocation10], %s3481_s19, %s3481_s19, %s3482_s20  }
  0x27   : > { %s3288_s11 = scalar_lea.hbm %s4214_s3, 256 }
  0x28   : > { %p3289_p4 = scmp.ne.s32.totalorder %s4214_s3, %s3288_s11  ;;  %p3295_p12 = scmp.lt.u32.totalorder %s3288_s11, %s4214_s3 }
  0x2a   : > { %p3291_p10 = pnand %p3289_p4, %p3592_p8 }
  0x2c   : > { %p3292_p11 = pneg %p3291_p10 }
  0x2e   : > { %p3297_p13 = pnand %p3295_p12, %p3292_p11 }
  0x30   : > { %3300 = shalt.err (!%p3297_p13)
}
  0x31   : > { %s3301_s26 = scalar_lea.vmem %s3580_s30, 256  ;;  %p3309_p7 = scmp.lt.s32.totalorder %s3580_s30, %s3580_s30 }
  0x32   : > { %p3302_p0 = scmp.ne.s32.totalorder %s3580_s30, %s3301_s26  ;;  %p3310_p9 = scmp.lt.s32.totalorder %s3301_s26, %s3301_s26 }
  0x34   : > { %p3304_p2 = pnand %p3302_p0, %p3592_p8  ;;  %p3311_p4 = por %p3310_p9, %p3309_p7 }
  0x36   : > { %p3305_p5 = pneg %p3304_p2 }
  0x38   : > { %p3312_p10 = pnand %p3311_p4, %p3305_p5 }
  0x3a   : > { %3315 = shalt.err (!%p3312_p10)
}
  0x3b   : > { %3126 = dma.hbm_to_vmem [thread:$0]  (!%p3576_p6), %s4214_s3, 256, %s3580_s30, [#allocation13], %s3481_s19, %s3481_s19, %s3482_s20  }
  0x3c   : > { %s3316_s8 = scalar_lea.hbm %s4213_s2, 256 }
  0x3d   : > { %p3317_p11 = scmp.ne.s32.totalorder %s4213_s2, %s3316_s8  ;;  %p3323_p0 = scmp.lt.u32.totalorder %s3316_s8, %s4213_s2 }
  0x3f   : > { %p3319_p12 = pnand %p3317_p11, %p3592_p8 }
  0x41   : > { %p3320_p13 = pneg %p3319_p12 }
  0x43   : > { %p3325_p2 = pnand %p3323_p0, %p3320_p13 }
  0x45   : > { %3328 = shalt.err (!%p3325_p2)
}
  0x46   : > { %s3329_s30 = scalar_lea.vmem %s3582_s9, 256  ;;  %p3337_p4 = scmp.lt.s32.totalorder %s3582_s9, %s3582_s9 }
  0x47   : > { %p3330_p5 = scmp.ne.s32.totalorder %s3582_s9, %s3329_s30  ;;  %p3338_p10 = scmp.lt.s32.totalorder %s3329_s30, %s3329_s30 }
  0x49   : > { %p3332_p7 = pnand %p3330_p5, %p3592_p8  ;;  %p3339_p11 = por %p3338_p10, %p3337_p4 }
  0x4b   : > { %p3333_p9 = pneg %p3332_p7 }
  0x4d   : > { %p3340_p12 = pnand %p3339_p11, %p3333_p9 }
  0x4f   : > { %3343 = shalt.err (!%p3340_p12)
}
  0x50   : > { %3123 = dma.hbm_to_vmem [thread:$0]  (!%p3576_p6), %s4213_s2, 256, %s3582_s9, [#allocation10], %s3481_s19, %s3481_s19, %s3482_s20  }
  0x51   : > { %s3483_s26 = smov [#allocation14]   ;;  %s3344_s29 = scalar_lea.hbm %s4215_s4, 256 }
  0x52   : > { %s237_s17 = sshll.u32 %s3483_s26, 4  ;;  %p3345_p13 = scmp.ne.s32.totalorder %s4215_s4, %s3344_s29  ;;  %s238_s17 = int_to_ptr.vmem [resolvable:$true] %s237_s17 }
  0x53   : > { %p3351_p5 = scmp.lt.u32.totalorder %s3344_s29, %s4215_s4 }
  0x54   : > { %p3347_p0 = pnand %p3345_p13, %p3592_p8 }
  0x56   : > { %p3348_p2 = pneg %p3347_p0 }
  0x58   : > { %p3353_p7 = pnand %p3351_p5, %p3348_p2 }
  0x5a   : > { %3356 = shalt.err (!%p3353_p7)
}
  0x5b   : > { %s3357_s9 = scalar_lea.vmem %s238_s17, 256  ;;  %p3365_p11 = scmp.lt.s32.totalorder %s238_s17, %s238_s17 }
  0x5c   : > { %p3358_p9 = scmp.ne.s32.totalorder %s238_s17, %s3357_s9  ;;  %p3366_p12 = scmp.lt.s32.totalorder %s3357_s9, %s3357_s9 }
  0x5e   : > { %p3360_p4 = pnand %p3358_p9, %p3592_p8  ;;  %p3367_p1 = por %p3366_p12, %p3365_p11 }
  0x60   : > { %p3361_p10 = pneg %p3360_p4 }
  0x62   : > { %p3368_p3 = pnand %p3367_p1, %p3361_p10 }
  0x64   : > { %3371 = shalt.err (!%p3368_p3)
}
  0x65   : > { %3129 = dma.hbm_to_vmem [thread:$0]  (!%p3576_p6), %s4215_s4, 256, %s238_s17, [#allocation13], %s3481_s19, %s3481_s19, %s3482_s20  }
  0x66   : > { %s2844_s7 = sadd.s32 4294967294, %s3476_s24   ;;  %s3691_s15 = sadd.s32 1, %s3476_s24  }
  0x67   : > { %s28_s14 = ssub.s32 %s3476_s24, %s3691_s15  ;;  %s31_s16 = sadd.s32 1, %s3472_s23 }
  0x68   : > { %p29_p1 = scmp.eq.s32.totalorder %s28_s14, 0  ;;  %p38_p3 = scmp.ne.s32.totalorder %s3472_s23, %s3468_s22 }
  0x69   : > { %p39_p8 = scmp.eq.s32.totalorder %s3476_s24, 0  ;;  %p44_p13 = scmp.ne.s32.totalorder %s3468_s22, %s3464_s21 }
  0x6a   : > { %s3702_s26 = scalar_select %p29_p1, %s3472_s23, %s31_s16  }
  0x6b   : > { %p3704_p0 = por %p39_p8, %p38_p3  ;;  %p4225_p2 = scmp.eq.s32.totalorder %s3560_s27, 0 }
  0x6c   : > { %p173_p5 = scmp.eq.s32.totalorder %s3560_s27, 1  ;;  %p179_p7 = scmp.eq.s32.totalorder %s2844_s7, 1 }
  0x6d   : > { %p3710_p6 = por %p4225_p2, %p44_p13  ;;  %p3142_p9 = scmp.lt.s32.totalorder %s3476_s24, 2 }
  0x6e   : > { %s254_s20 = sand.u32 1, %s3472_s23   ;;  %p3717_p4 = por %p173_p5, %p38_p3 }
  0x6f   : > { %p3721_p10 = por %p179_p7, %p44_p13  ;;  %s2851_s29 = sshll.u32 %s254_s20, 3 }
  0x70   : > { %s4227_s17 = scalar_select %p3717_p4, 1, 0 }
  0x71   : > { %s4228_s25 = scalar_select %p3721_p10, 1, 0 }
  0x72   : > { %s2852_s8 = sshll.u32 %s3476_s24, 7  ;;  %s258_s9 = scalar_lea.vmem [#allocation6], %s2851_s29 }
  0x73   : > { %s3729_s12 = scalar_lea.hbm %s4211_s0, %s2852_s8  ;;  %s265_s13 = sshll.u32 %s258_s9, 4  ;;  %s3731_s13 = int_to_ptr.vmem [resolvable:$true] %s265_s13 }
  0x74   : > { %p3735_p11 = pnand %p3142_p9, %p3704_p0  ;;  %s255_s7 = scalar_lea.sflag [#allocation7], %s254_s20 }
  0x75   : > { %s3372_s14 = scalar_lea.hbm %s3729_s12, 128  ;;  %s3377_s8 = scalar_lea.hbm %s4211_s0, 256 }
  0x76   : > { %p3373_p12 = scmp.ne.s32.totalorder %s3729_s12, %s3372_s14  ;;  %p3374_p1 = pneg %p3735_p11 }
  0x77   : > { %p3378_p13 = scmp.lt.u32.totalorder %s3729_s12, %s4211_s0  ;;  %p3379_p0 = scmp.lt.u32.totalorder %s3377_s8, %s3372_s14 }
  0x78   : > { %p3375_p3 = pnand %p3374_p1, %p3373_p12  ;;  %p3381_p5 = scmp.lt.u32.totalorder %s3372_s14, %s3729_s12 }
  0x79   : > { %p3380_p2 = por %p3379_p0, %p3378_p13 }
  0x7a   : > { %p3376_p8 = pneg %p3375_p3 }
  0x7b   : > { %p3382_p7 = por %p3381_p5, %p3380_p2 }
  0x7d   : > { %p3383_p9 = pnand %p3382_p7, %p3376_p8 }
  0x7f   : > { %3386 = shalt.err (!%p3383_p9)
}
  0x80   : > { %s3387_s20 = scalar_lea.vmem %s3731_s13, 128  ;;  %s3484_s11 = smov [#allocation6]  }
  0x81   : > { %p3388_p12 = scmp.ne.s32.totalorder %s3731_s13, %s3387_s20  ;;  %s3392_s9 = sshll.u32 %s3484_s11, 4  ;;  %s3393_s9 = int_to_ptr.vmem [resolvable:$false] %s3392_s9 }
  0x82   : > { %s3394_s16 = scalar_lea.vmem %s3393_s9, 256  ;;  %p3395_p4 = scmp.lt.s32.totalorder %s3731_s13, %s3393_s9 }
  0x83   : > { %p3390_p3 = pnand %p3388_p12, %p3374_p1  ;;  %p3396_p13 = scmp.lt.s32.totalorder %s3394_s16, %s3387_s20 }
  0x85   : > { %p3391_p10 = pneg %p3390_p3  ;;  %p3397_p0 = por %p3396_p13, %p3395_p4 }
  0x87   : > { %p3398_p2 = pnand %p3397_p0, %p3391_p10 }
  0x89   : > { %3401 = shalt.err (!%p3398_p2)
}
  0x8a   : > { %3133 = dma.hbm_to_vmem [thread:$0]  (!%p3735_p11), %s3729_s12, 128, %s3731_s13, %s255_s7  }
  0x8b   : > { %p4230_p8 = scmp.ne.s32.totalorder %s4221_s28, 0 }
  0x8c   : > { %s3767_s14 = sand.u32 (!%p4230_p8), 1, %s3468_s22  }
  0x8d   : > { %274 = sbr.rel (%p4230_p8) target bundleno = 1580 (0x62c), region = 44  ;;  %s2854_s29 = sshll.u32 (!%p4230_p8), %s3767_s14, 3 }
  0x8e   : > { %s277_s8 = scalar_lea.sflag (!%p4230_p8), [#allocation7], %s3767_s14  ;;  %s280_s18 = scalar_lea.vmem (!%p4230_p8), [#allocation6], %s2854_s29 }
  0x94   : > { %3447 = dma.done.wait (%p3710_p6), %s277_s8, 128  }
  0x95   : > { %3449 = vsyncadd (%p3710_p6), %s277_s8, 4294967168  ;;  %p4231_p4 = scmp.eq.s32.totalorder %s3560_s27, 0 }
  0x97   : > { %3451 = dma.done.wait (%p4231_p4), [#allocation10], 512   ;;  %p4232_p10 = pmov %p4231_p4 }
  0x98   : > { %p4233_p11 = pmov %p4231_p4 }
  0x99   : > { %3453 = vsyncadd (%p4232_p10), [#allocation10], 4294966784 }
  0x9a   : > { %3455 = dma.done.wait (%p4233_p11), [#allocation13], 512   ;;  %p4234_p1 = pmov %p4231_p4 }
  0x9b   : > { %v3485_v0 = vmov 0.0   ;;  %vm3486_vm0 = vmmov 0   ;;  %v3204_v1 = vld [vmem:[#allocation11] sm:$0xff]   ;;  %v3205_v2 = vld [vmem:[#allocation9] sm:$0xff]   ;;  %v3206_v3 = vld [vmem:[#allocation11 + $0x8] sm:$0xff]   ;;  %vm344_vm1 = vcmask 261120   ;;  %v528_v24 = vlaneseq }
  0x9c   : > { %3457 = vsyncadd (%p4234_p1), [#allocation13], 4294966784  ;;  %2977 = vmatprep.subr.bf16.mxu1 %v3485_v0  ;;  %2969 = vmatprep.subr.bf16.mxu0 %v3485_v0  ;;  %v3207_v4 = vld [vmem:[#allocation9 + $0x8] sm:$0xff]   ;;  %v326_v5 = vld [vmem:[%s280_s18] sm:$0xff]  ;;  %s3487_s28 = smov 116   ;;  %s3488_s19 = smov 124  }
  0x9d   : > { %2981 = vmatprep.mubr.msk.bf16.mxu1 %vm3486_vm0, %v3485_v0  ;;  %2973 = vmatprep.mubr.msk.bf16.mxu0 %vm3486_vm0, %v3485_v0  ;;  %v327_v6 = vpack.c.bf16 %v326_v5, %v326_v5  ;;  %v3208_v7 = vld [vmem:[#allocation12] sm:$0xff]   ;;  %v3209_v8 = vld [vmem:[#allocation12 + $0x8] sm:$0xff]   ;;  %s3489_s12 = smov 120   ;;  %s3490_s13 = smov 112   ;;  %v3494_v22 = vmov 1983009808  }
  0x9e   : > { %2978 = vmatpush3.bf16.msra.mxu1 %v3204_v1  ;;  %2970 = vmatpush3.bf16.msra.mxu0 %v3205_v2  ;;  %s3491_s30 = smov 108   ;;  %s3492_s7 = smov 104   ;;  %v526_v23 = vunpack.c.l.s4 %v3494_v22  ;;  %v3495_v25 = vmov 1934713408   ;;  %v529_v28 = vshrl.u32 %v528_v24, 7  ;;  %vm803_vm2 = vcmask 27648  }
  0x9f   : > { %2979 = vmatprep.subr.bf16.mxu1 %v3485_v0  ;;  %2971 = vmatprep.subr.bf16.mxu0 %v3485_v0  ;;  %s3493_s10 = smov 100   ;;  %v590_v26 = vunpack.c.l.s4 %v3495_v25  ;;  %vm1456_vm3 = vcmask 31744   ;;  %vm1949_vm4 = vcmask 1043456   ;;  %vm1825_vm5 = vcmask 64512   ;;  %s3496_s20 = smov 8  }
  0xa0   : > { %v527_v27 = vunpack.c.0.s8 %v526_v23  ;;  %s3497_s11 = smov 4   ;;  %s3498_s9 = smov 12   ;;  %vm2641_vm6 = vcmask 97280   ;;  %vm2643_vm7 = vcmask 130048   ;;  %vm2645_vm8 = vcmask 162816  }
  0xa1   : > { %v591_v31 = vunpack.c.0.s8 %v590_v26  ;;  %s3499_s16 = smov 20   ;;  %s3500_s8 = smov 16   ;;  %vm2647_vm9 = vcmask 195584   ;;  %vm2649_vm10 = vcmask 228352   ;;  %vm2652_vm11 = vcmask 257024  }
  0xa2   : > { %2980 = vmatpush3.bf16.msra.mxu1 %v3206_v3  ;;  %2972 = vmatpush3.bf16.msra.mxu0 %v3207_v4  ;;  %v3829_v32 = vsub.s32 %v527_v27, %v529_v28  ;;  %s3501_s18 = smov 28   ;;  %p4235_p5 = scmp.ne.s32.totalorder %s4227_s17, 0 }
  0xa3   : > { %2993 = vmatprep.subr.bf16.mxu1 %v3485_v0  ;;  %2985 = vmatprep.subr.bf16.mxu0 %v3485_v0  ;;  %v3831_v39 = vsub.s32 %v591_v31, %v529_v28 }
  0xa5   : > { %2982 = vmatmul.mubr.msk.bf16.vlgmr.msra.gmra.mrb[0].mxu1 %vm344_vm1, %v327_v6  ;;  %2974 = vmatmul.mubr.msk.bf16.vlgmr.msra.gmra.mrb[0].mxu0 %vm344_vm1, %v327_v6 }
  0xa6   : > { %2995 = vmatprep.mubr.msk.bf16.mxu1 %vm3486_vm0, %v3485_v0  ;;  %2986 = vmatpush3.bf16.msra.mxu0 %v3208_v7 }
  0xa7   : > { %2989 = vmatprep.mubr.msk.bf16.mxu0 %vm3486_vm0, %v3485_v0  ;;  %2987 = vmatprep.subr.bf16.mxu0 %v3485_v0 }
  0xaa   : > { %2988 = vmatpush3.bf16.msra.mxu0 %v3209_v8 }
  0xab   : > { %2999 = vmatprep.subr.bf16.mxu0 %v3485_v0 }
  0xad   : > { %2990 = vmatmul.mubr.msk.bf16.vlgmr.msra.gmra.mrb[4].mxu0 %vm344_vm1, %v327_v6 }
  0xae   : > { %3001 = vmatprep.mubr.msk.bf16.mxu0 %vm3486_vm0, %v3485_v0 }
 0x178   : > { %v439_v9 = vpop.f32.mrb[0].mxu1  ;;  %v382_v11 = vpop.f32.mrb[0].mxu0 }
 0x179   : > { %819 = vrot.lane.b32.xlu1 %v439_v9, %s3487_s28  ;;  %813 = vrot.lane.b32.xlu0 %v439_v9, %s3488_s19  ;;  %v2983_v10 = vpop.f32.mrb[1].mxu1  ;;  %v3807_v12 = vmul.f32 0.17677669, %v382_v11  ;;  %v2975_v14 = vpop.f32.mrb[1].mxu0 }
 0x17a   : > { %v442_v13 = vpop.f32.mrb[2].mxu1  ;;  %v385_v16 = vpop.f32.mrb[2].mxu0 }
 0x17b   : > { %v2984_v15 = vpop.f32.mrb[3].mxu1  ;;  %v2976_v17 = vpop.f32.mrb[3].mxu0 }
 0x17d   : > { %816 = vrot.lane.b32.xlu0 %v439_v9, %s3489_s12  ;;  %502 = vrot.lane.b32.xlu1 %v3807_v12, %s3488_s19 }
 0x180   : > { %v3821_v18 = vpop.f32.mrb[4].mxu0 }
 0x181   : > { %505 = vrot.lane.b32.xlu0 %v3807_v12, %s3489_s12  ;;  %508 = vrot.lane.b32.xlu1 %v3807_v12, %s3487_s28  ;;  %v2991_v19 = vpop.f32.mrb[5].mxu0 }
 0x182   : > { %v498_v20 = vpop.f32.mrb[6].mxu0 }
 0x183   : > { %v2992_v21 = vpop.f32.mrb[7].mxu0 }
 0x185   : > { %822 = vrot.lane.b32.xlu0 %v439_v9, %s3490_s13  ;;  %825 = vrot.lane.b32.xlu1 %v439_v9, %s3491_s30 }
 0x189   : > { %828 = vrot.lane.b32.xlu0 %v439_v9, %s3492_s7  ;;  %831 = vrot.lane.b32.xlu1 %v439_v9, %s3493_s10 }
 0x18d   : > { %511 = vrot.lane.b32.xlu0 %v3807_v12, %s3490_s13  ;;  %514 = vrot.lane.b32.xlu1 %v3807_v12, %s3491_s30 }
 0x191   : > { %517 = vrot.lane.b32.xlu0 %v3807_v12, %s3492_s7  ;;  %520 = vrot.lane.b32.xlu1 %v3807_v12, %s3493_s10 }
 0x195   : > { %1123 = vrot.lane.b32.xlu0 %v3821_v18, %s3488_s19  ;;  %1126 = vrot.lane.b32.xlu1 %v3821_v18, %s3489_s12 }
 0x199   : > { %1129 = vrot.lane.b32.xlu0 %v3821_v18, %s3487_s28  ;;  %1135 = vrot.lane.b32.xlu1 %v3821_v18, %s3491_s30  ;;  %s3502_s28 = smov 24   ;;  %s324_s30 = scalar_lea.vmem [#allocation15], %s2854_s29 }
 0x19d   : > { %1132 = vrot.lane.b32.xlu0 %v3821_v18, %s3490_s13  ;;  %s2922_s13 = sshll.u32 %s3560_s27, 7  ;;  %s2723_s27 = scalar_lea.sflag [#allocation8], %s3767_s14 }
 0x1eb   : > { %v820_v29 = vpop.permute.xlu1 %819  ;;  %v814_v30 = vpop.permute.xlu0 %813 }
 0x1ec   : > { %v850_v33 = vcombine.low %v814_v30, %v820_v29  ;;  %v851_v34 = vcombine.high %v814_v30, %v820_v29 }
 0x1ee   : > { %v858_v40 = vrot.slane %v850_v33, %v3829_v32  ;;  %v865_v41 = vrot.slane %v851_v34, %v3829_v32 }
 0x1ef   : > { %v817_v35 = vpop.permute.xlu0 %816  ;;  %v503_v36 = vpop.permute.xlu1 %502 }
 0x1f0   : > { %v834_v37 = vcombine.low %v439_v9, %v817_v35  ;;  %v835_v38 = vcombine.high %v439_v9, %v817_v35 }
 0x1f2   : > { %v842_v42 = vrot.slane %v834_v37, %v3829_v32  ;;  %v849_v43 = vrot.slane %v835_v38, %v3829_v32 }
 0x1f3   : > { %v506_v44 = vpop.permute.xlu0 %505  ;;  %v509_v45 = vpop.permute.xlu1 %508 }
 0x1f4   : > { %v898_v46 = vcombine.low %v842_v42, %v858_v40  ;;  %v899_v47 = vcombine.high %v842_v42, %v858_v40  ;;  %v914_v48 = vcombine.low %v849_v43, %v865_v41  ;;  %v915_v49 = vcombine.high %v849_v43, %v865_v41 }
 0x1f5   : > { %v523_v50 = vcombine.low %v3807_v12, %v506_v44  ;;  %v524_v51 = vcombine.high %v3807_v12, %v506_v44  ;;  %v539_v52 = vcombine.low %v503_v36, %v509_v45  ;;  %v540_v53 = vcombine.high %v503_v36, %v509_v45 }
 0x1f6   : > { %v906_v54 = vrot.slane %v898_v46, %v3831_v39  ;;  %v913_v55 = vrot.slane %v899_v47, %v3831_v39  ;;  %v922_v56 = vrot.slane %v914_v48, %v3831_v39  ;;  %v929_v57 = vrot.slane %v915_v49, %v3831_v39 }
 0x1f7   : > { %v531_v58 = vrot.slane %v523_v50, %v3829_v32  ;;  %v538_v59 = vrot.slane %v524_v51, %v3829_v32  ;;  %v547_v60 = vrot.slane %v539_v52, %v3829_v32  ;;  %v554_v61 = vrot.slane %v540_v53, %v3829_v32  ;;  %v3847_v62 = vpop.permute.xlu0 %822  ;;  %v3849_v63 = vpop.permute.xlu1 %825 }
 0x1f8   : > { %v2877_v1 = vcombine.low %v906_v54, %v913_v55  ;;  %v2879_v2 = vcombine.high %v906_v54, %v913_v55  ;;  %v2881_v3 = vcombine.low %v922_v56, %v929_v57  ;;  %v2883_v4 = vcombine.high %v922_v56, %v929_v57 }
 0x1f9   : > { %v587_v5 = vcombine.low %v531_v58, %v547_v60  ;;  %v588_v6 = vcombine.high %v531_v58, %v547_v60  ;;  %v603_v7 = vcombine.low %v538_v59, %v554_v61  ;;  %v604_v8 = vcombine.high %v538_v59, %v554_v61 }
 0x1fa   : > { %v978_v9 = vrot.slane %v2877_v1, %v3829_v32  ;;  %v994_v10 = vrot.slane %v2879_v2, %v3829_v32  ;;  %v1010_v11 = vrot.slane %v2881_v3, %v3829_v32  ;;  %v1026_v12 = vrot.slane %v2883_v4, %v3829_v32 }
 0x1fb   : > { %v595_v13 = vrot.slane %v587_v5, %v3831_v39  ;;  %v602_v14 = vrot.slane %v588_v6, %v3831_v39  ;;  %v611_v15 = vrot.slane %v603_v7, %v3831_v39  ;;  %v618_v16 = vrot.slane %v604_v8, %v3831_v39  ;;  %v829_v17 = vpop.permute.xlu0 %828  ;;  %v832_v19 = vpop.permute.xlu1 %831 }
 0x1fc   : > { %v1034_v20 = vcombine.low %v978_v9, %v994_v10  ;;  %v1035_v21 = vcombine.high %v978_v9, %v994_v10  ;;  %v1066_v22 = vcombine.low %v1010_v11, %v1026_v12  ;;  %v1067_v23 = vcombine.high %v1010_v11, %v1026_v12 }
 0x1fd   : > { %v2869_v24 = vcombine.low %v595_v13, %v602_v14  ;;  %v2871_v25 = vcombine.high %v595_v13, %v602_v14  ;;  %v2873_v26 = vcombine.low %v611_v15, %v618_v16  ;;  %v2875_v27 = vcombine.high %v611_v15, %v618_v16 }
 0x1fe   : > { %v1042_v28 = vrot.slane %v1034_v20, %v3831_v39  ;;  %v1049_v29 = vrot.slane %v1035_v21, %v3831_v39  ;;  %v1074_v30 = vrot.slane %v1066_v22, %v3831_v39  ;;  %v1081_v31 = vrot.slane %v1067_v23, %v3831_v39 }
 0x1ff   : > { %v667_v33 = vrot.slane %v2869_v24, %v3829_v32  ;;  %v683_v34 = vrot.slane %v2871_v25, %v3829_v32  ;;  %v699_v35 = vrot.slane %v2873_v26, %v3829_v32  ;;  %v715_v36 = vrot.slane %v2875_v27, %v3829_v32  ;;  %v512_v42 = vpop.permute.xlu0 %511  ;;  %v515_v43 = vpop.permute.xlu1 %514 }
 0x200   : > { %v1098_v37 = vcombine.low %v1042_v28, %v1074_v30  ;;  %v1099_v38 = vcombine.high %v1042_v28, %v1074_v30  ;;  %v1100_v40 = vcombine.low %v1049_v29, %v1081_v31  ;;  %v1101_v41 = vcombine.high %v1049_v29, %v1081_v31 }
 0x201   : > { %v723_v44 = vcombine.low %v667_v33, %v683_v34  ;;  %v724_v45 = vcombine.high %v667_v33, %v683_v34  ;;  %v755_v46 = vcombine.low %v699_v35, %v715_v36  ;;  %v756_v47 = vcombine.high %v699_v35, %v715_v36 }
 0x202   : > { %v1106_v48 = vpack.c.bf16 %v1098_v37, %v1098_v37  ;;  %v1107_v49 = vpack.c.bf16 %v1099_v38, %v1099_v38  ;;  %v1108_v50 = vpack.c.bf16 %v1100_v40, %v1100_v40  ;;  %v1109_v51 = vpack.c.bf16 %v1101_v41, %v1101_v41 }
 0x203   : > { %v731_v52 = vrot.slane %v723_v44, %v3831_v39  ;;  %v738_v53 = vrot.slane %v724_v45, %v3831_v39  ;;  %v763_v54 = vrot.slane %v755_v46, %v3831_v39  ;;  %v770_v55 = vrot.slane %v756_v47, %v3831_v39  ;;  %v518_v7 = vpop.permute.xlu0 %517  ;;  %v521_v8 = vpop.permute.xlu1 %520 }
 0x204   : > { %1114 = vst.msk [vmem:[#allocation3] sm:$0xf] %vm803_vm2, %v1106_v48  ;;  %1115 = vst.msk [vmem:[#allocation3 + $0x4] sm:$0xf] %vm803_vm2, %v1107_v49  ;;  %v866_v56 = vcombine.low %v3847_v62, %v829_v17  ;;  %v867_v57 = vcombine.high %v3847_v62, %v829_v17  ;;  %v882_v58 = vcombine.low %v3849_v63, %v832_v19 }
 0x205   : > { %1116 = vst.msk [vmem:[#allocation3 + $0x8] sm:$0xf] %vm803_vm2, %v1108_v50  ;;  %1117 = vst.msk [vmem:[#allocation3 + $0xc] sm:$0xf] %vm803_vm2, %v1109_v51  ;;  %v883_v59 = vcombine.high %v3849_v63, %v832_v19  ;;  %v787_v60 = vcombine.low %v731_v52, %v763_v54  ;;  %v788_v61 = vcombine.high %v731_v52, %v763_v54 }
 0x206   : > { %v789_v1 = vcombine.low %v738_v53, %v770_v55  ;;  %v790_v2 = vcombine.high %v738_v53, %v770_v55  ;;  %v874_v3 = vrot.slane %v866_v56, %v3829_v32  ;;  %v881_v4 = vrot.slane %v867_v57, %v3829_v32 }
 0x207   : > { %v890_v5 = vrot.slane %v882_v58, %v3829_v32  ;;  %v897_v6 = vrot.slane %v883_v59, %v3829_v32  ;;  %v795_v9 = vpack.c.bf16 %v787_v60, %v787_v60  ;;  %v796_v62 = vpack.c.bf16 %v788_v61, %v788_v61 }
 0x208   : > { %v797_v10 = vpack.c.bf16 %v789_v1, %v789_v1  ;;  %v798_v11 = vpack.c.bf16 %v790_v2, %v790_v2  ;;  %v555_v15 = vcombine.low %v512_v42, %v518_v7  ;;  %v556_v16 = vcombine.high %v512_v42, %v518_v7 }
 0x209   : > { %v930_v12 = vcombine.low %v874_v3, %v890_v5  ;;  %v931_v63 = vcombine.high %v874_v3, %v890_v5  ;;  %v946_v13 = vcombine.low %v881_v4, %v897_v6  ;;  %v947_v14 = vcombine.high %v881_v4, %v897_v6  ;;  %804 = vst.msk [vmem:[#allocation2] sm:$0xf] %vm803_vm2, %v795_v9 }
 0x20a   : > { %805 = vst.msk [vmem:[#allocation2 + $0x4] sm:$0xf] %vm803_vm2, %v796_v62  ;;  %806 = vst.msk [vmem:[#allocation2 + $0x8] sm:$0xf] %vm803_vm2, %v797_v10  ;;  %v571_v17 = vcombine.low %v515_v43, %v521_v8  ;;  %v572_v19 = vcombine.high %v515_v43, %v521_v8  ;;  %v563_v24 = vrot.slane %v555_v15, %v3829_v32 }
 0x20b   : > { %807 = vst.msk [vmem:[#allocation2 + $0xc] sm:$0xf] %vm803_vm2, %v798_v11  ;;  %v938_v20 = vrot.slane %v930_v12, %v3831_v39  ;;  %v945_v21 = vrot.slane %v931_v63, %v3831_v39  ;;  %v954_v22 = vrot.slane %v946_v13, %v3831_v39  ;;  %v961_v23 = vrot.slane %v947_v14, %v3831_v39  ;;  %v1440_v9 = vld [vmem:[#allocation3] sm:$0xf]  ;;  %v1441_v62 = vld [vmem:[#allocation3 + $0x4] sm:$0xf] }
 0x20c   : > { %v570_v25 = vrot.slane %v556_v16, %v3829_v32  ;;  %v579_v26 = vrot.slane %v571_v17, %v3829_v32  ;;  %v586_v27 = vrot.slane %v572_v19, %v3829_v32  ;;  %v1461_v17 = vsel %vm1456_vm3, %v1440_v9, 0 }
 0x20d   : > { %v2878_v28 = vcombine.low %v938_v20, %v945_v21  ;;  %v2880_v29 = vcombine.high %v938_v20, %v945_v21  ;;  %v2882_v30 = vcombine.low %v954_v22, %v961_v23  ;;  %v2884_v31 = vcombine.high %v954_v22, %v961_v23  ;;  %2994 = vmatpush3.bf16.xpose.msra.mxu1 %v1461_v17 }
 0x20e   : > { %v619_v33 = vcombine.low %v563_v24, %v579_v26  ;;  %v620_v34 = vcombine.high %v563_v24, %v579_v26  ;;  %v635_v35 = vcombine.low %v570_v25, %v586_v27  ;;  %v636_v36 = vcombine.high %v570_v25, %v586_v27  ;;  %3005 = vmatprep.subr.bf16.mxu1 %v3485_v0 }
 0x20f   : > { %v985_v37 = vrot.slane %v2878_v28, %v3829_v32  ;;  %v1001_v38 = vrot.slane %v2880_v29, %v3829_v32  ;;  %v1017_v40 = vrot.slane %v2882_v30, %v3829_v32  ;;  %v1033_v41 = vrot.slane %v2884_v31, %v3829_v32  ;;  %v1442_v28 = vld [vmem:[#allocation3 + $0x8] sm:$0xf]  ;;  %v1443_v29 = vld [vmem:[#allocation3 + $0xc] sm:$0xf] }
 0x210   : > { %v627_v42 = vrot.slane %v619_v33, %v3831_v39  ;;  %v634_v43 = vrot.slane %v620_v34, %v3831_v39  ;;  %v643_v44 = vrot.slane %v635_v35, %v3831_v39  ;;  %v650_v45 = vrot.slane %v636_v36, %v3831_v39  ;;  %v1432_v30 = vld [vmem:[#allocation2] sm:$0xf] }
 0x211   : > { %v1050_v46 = vcombine.low %v985_v37, %v1001_v38  ;;  %v1051_v47 = vcombine.high %v985_v37, %v1001_v38  ;;  %v1082_v48 = vcombine.low %v1017_v40, %v1033_v41  ;;  %v1083_v49 = vcombine.high %v1017_v40, %v1033_v41  ;;  %v1433_v31 = vld [vmem:[#allocation2 + $0x4] sm:$0xf]  ;;  %v1434_v37 = vld [vmem:[#allocation2 + $0x8] sm:$0xf] }
 0x212   : > { %v2870_v50 = vcombine.low %v627_v42, %v634_v43  ;;  %v2872_v51 = vcombine.high %v627_v42, %v634_v43  ;;  %v2874_v52 = vcombine.low %v643_v44, %v650_v45  ;;  %v2876_v53 = vcombine.high %v643_v44, %v650_v45  ;;  %v1435_v38 = vld [vmem:[#allocation2 + $0xc] sm:$0xf] }
 0x213   : > { %v1058_v54 = vrot.slane %v1050_v46, %v3831_v39  ;;  %v1065_v55 = vrot.slane %v1051_v47, %v3831_v39  ;;  %v1090_v56 = vrot.slane %v1082_v48, %v3831_v39  ;;  %v1097_v57 = vrot.slane %v1083_v49, %v3831_v39 }
 0x214   : > { %v674_v58 = vrot.slane %v2870_v50, %v3829_v32  ;;  %v690_v59 = vrot.slane %v2872_v51, %v3829_v32  ;;  %v706_v60 = vrot.slane %v2874_v52, %v3829_v32  ;;  %v722_v61 = vrot.slane %v2876_v53, %v3829_v32  ;;  %2996 = vmatmul.mubr.msk.bf16.vlgmr.msra.gmra.mrb[4].mxu1 %vm1456_vm3, %v1432_v30  ;;  %v1124_v50 = vpop.permute.xlu0 %1123  ;;  %v1127_v51 = vpop.permute.xlu1 %1126 }
 0x215   : > { %v1102_v1 = vcombine.low %v1058_v54, %v1090_v56  ;;  %v1103_v2 = vcombine.high %v1058_v54, %v1090_v56  ;;  %v1104_v3 = vcombine.low %v1065_v55, %v1097_v57  ;;  %v1105_v4 = vcombine.high %v1065_v55, %v1097_v57  ;;  %3007 = vmatprep.mubr.msk.bf16.mxu1 %vm3486_vm0, %v3485_v0 }
 0x216   : > { %v739_v5 = vcombine.low %v674_v58, %v690_v59  ;;  %v740_v6 = vcombine.high %v674_v58, %v690_v59  ;;  %v771_v7 = vcombine.low %v706_v60, %v722_v61  ;;  %v772_v8 = vcombine.high %v706_v60, %v722_v61 }
 0x217   : > { %v1110_v10 = vpack.c.bf16 %v1102_v1, %v1102_v1  ;;  %v1111_v11 = vpack.c.bf16 %v1103_v2, %v1103_v2  ;;  %v1112_v12 = vpack.c.bf16 %v1104_v3, %v1104_v3  ;;  %v1113_v63 = vpack.c.bf16 %v1105_v4, %v1105_v4 }
 0x218   : > { %v747_v13 = vrot.slane %v739_v5, %v3831_v39  ;;  %v754_v14 = vrot.slane %v740_v6, %v3831_v39  ;;  %v779_v15 = vrot.slane %v771_v7, %v3831_v39  ;;  %v786_v16 = vrot.slane %v772_v8, %v3831_v39  ;;  %v1130_v54 = vpop.permute.xlu0 %1129 }
 0x219   : > { %1118 = vst.msk [vmem:[#allocation3 + $0x10] sm:$0xf] %vm803_vm2, %v1110_v10  ;;  %1119 = vst.msk [vmem:[#allocation3 + $0x14] sm:$0xf] %vm803_vm2, %v1111_v11  ;;  %v1507_v19 = vsel %vm1456_vm3, %v1441_v62, 0  ;;  %v1553_v33 = vsel %vm1456_vm3, %v1442_v28, 0  ;;  %v1144_v52 = vcombine.low %v3821_v18, %v1127_v51  ;;  %v1145_v53 = vcombine.high %v3821_v18, %v1127_v51 }
 0x21a   : > { %1120 = vst.msk [vmem:[#allocation3 + $0x18] sm:$0xf] %vm803_vm2, %v1112_v12  ;;  %1121 = vst.msk [vmem:[#allocation3 + $0x1c] sm:$0xf] %vm803_vm2, %v1113_v63  ;;  %v791_v20 = vcombine.low %v747_v13, %v779_v15  ;;  %v792_v21 = vcombine.high %v747_v13, %v779_v15  ;;  %v793_v22 = vcombine.low %v754_v14, %v786_v16  ;;  %3000 = vmatpush3.bf16.xpose.msra.mxu0 %v1507_v19 }
 0x21b   : > { %v794_v23 = vcombine.high %v754_v14, %v786_v16  ;;  %3011 = vmatprep.subr.bf16.mxu0 %v3485_v0  ;;  %3006 = vmatpush3.bf16.xpose.msra.mxu1 %v1553_v33  ;;  %v1599_v34 = vsel %vm1456_vm3, %v1443_v29, 0  ;;  %v1152_v55 = vrot.slane %v1144_v52, %v3829_v32  ;;  %v1159_v56 = vrot.slane %v1145_v53, %v3829_v32 }
 0x21c   : > { %v799_v24 = vpack.c.bf16 %v791_v20, %v791_v20  ;;  %v800_v25 = vpack.c.bf16 %v792_v21, %v792_v21  ;;  %v801_v26 = vpack.c.bf16 %v793_v22, %v793_v22  ;;  %3017 = vmatprep.subr.bf16.mxu1 %v3485_v0  ;;  %v1160_v57 = vcombine.low %v1124_v50, %v1130_v54 }
 0x21d   : > { %v802_v27 = vpack.c.bf16 %v794_v23, %v794_v23  ;;  %v1161_v58 = vcombine.high %v1124_v50, %v1130_v54 }
 0x21e   : > { %808 = vst.msk [vmem:[#allocation2 + $0x10] sm:$0xf] %vm803_vm2, %v799_v24  ;;  %809 = vst.msk [vmem:[#allocation2 + $0x14] sm:$0xf] %vm803_vm2, %v800_v25  ;;  %v1168_v59 = vrot.slane %v1160_v57, %v3829_v32 }
 0x21f   : > { %810 = vst.msk [vmem:[#allocation2 + $0x18] sm:$0xf] %vm803_vm2, %v801_v26  ;;  %811 = vst.msk [vmem:[#allocation2 + $0x1c] sm:$0xf] %vm803_vm2, %v802_v27  ;;  %v1175_v60 = vrot.slane %v1161_v58, %v3829_v32 }
 0x220   : > { %v1444_v35 = vld [vmem:[#allocation3 + $0x10] sm:$0xf]  ;;  %v1445_v36 = vld [vmem:[#allocation3 + $0x14] sm:$0xf]  ;;  %v1208_v61 = vcombine.low %v1152_v55, %v1168_v59  ;;  %v1209_v1 = vcombine.high %v1152_v55, %v1168_v59 }
 0x221   : > { %3002 = vmatmul.mubr.msk.bf16.vlgmr.msra.gmra.mrb[8].mxu0 %vm1456_vm3, %v1433_v31  ;;  %v1645_v40 = vsel %vm1456_vm3, %v1444_v35, 0  ;;  %v1691_v41 = vsel %vm1456_vm3, %v1445_v36, 0  ;;  %v1446_v42 = vld [vmem:[#allocation3 + $0x18] sm:$0xf]  ;;  %v1447_v43 = vld [vmem:[#allocation3 + $0x1c] sm:$0xf]  ;;  %v1224_v2 = vcombine.low %v1159_v56, %v1175_v60  ;;  %v1225_v3 = vcombine.high %v1159_v56, %v1175_v60 }
 0x222   : > { %3012 = vmatpush3.bf16.xpose.msra.mxu0 %v1599_v34  ;;  %3013 = vmatprep.mubr.msk.bf16.mxu0 %vm3486_vm0, %v3485_v0  ;;  %v1737_v46 = vsel %vm1456_vm3, %v1446_v42, 0  ;;  %v1783_v47 = vsel %vm1456_vm3, %v1447_v43, 0  ;;  %v1216_v4 = vrot.slane %v1208_v61, %v3831_v39  ;;  %v1223_v5 = vrot.slane %v1209_v1, %v3831_v39 }
 0x223   : > { %3023 = vmatprep.subr.bf16.mxu0 %v3485_v0  ;;  %3008 = vmatmul.mubr.msk.bf16.vlgmr.msra.gmra.mrb[8].mxu1 %vm1456_vm3, %v1434_v37  ;;  %v1232_v6 = vrot.slane %v1224_v2, %v3831_v39  ;;  %v1239_v7 = vrot.slane %v1225_v3, %v3831_v39 }
 0x224   : > { %3018 = vmatpush3.bf16.xpose.msra.mxu1 %v1645_v40  ;;  %3019 = vmatprep.mubr.msk.bf16.mxu1 %vm3486_vm0, %v3485_v0  ;;  %v2885_v8 = vcombine.low %v1216_v4, %v1223_v5  ;;  %v2887_v9 = vcombine.high %v1216_v4, %v1223_v5 }
 0x225   : > { %3029 = vmatprep.subr.bf16.mxu1 %v3485_v0  ;;  %v1436_v44 = vld [vmem:[#allocation2 + $0x10] sm:$0xf]  ;;  %v1437_v45 = vld [vmem:[#allocation2 + $0x14] sm:$0xf]  ;;  %v2889_v62 = vcombine.low %v1232_v6, %v1239_v7  ;;  %v2891_v10 = vcombine.high %v1232_v6, %v1239_v7 }
 0x226   : > { %v1438_v48 = vld [vmem:[#allocation2 + $0x18] sm:$0xf]  ;;  %v1439_v49 = vld [vmem:[#allocation2 + $0x1c] sm:$0xf]  ;;  %v1288_v11 = vrot.slane %v2885_v8, %v3829_v32  ;;  %v1304_v12 = vrot.slane %v2887_v9, %v3829_v32 }
 0x227   : > { %v1320_v63 = vrot.slane %v2889_v62, %v3829_v32  ;;  %v1336_v13 = vrot.slane %v2891_v10, %v3829_v32 }
 0x228   : > { %v1344_v14 = vcombine.low %v1288_v11, %v1304_v12  ;;  %v1345_v15 = vcombine.high %v1288_v11, %v1304_v12 }
 0x229   : > { %3014 = vmatmul.mubr.msk.bf16.vlgmr.msra.gmra.mrb[12].mxu0 %vm1456_vm3, %v1435_v38  ;;  %v1376_v16 = vcombine.low %v1320_v63, %v1336_v13  ;;  %v1377_v17 = vcombine.high %v1320_v63, %v1336_v13 }
 0x22a   : > { %3024 = vmatpush3.bf16.xpose.msra.mxu0 %v1691_v41  ;;  %3025 = vmatprep.mubr.msk.bf16.mxu0 %vm3486_vm0, %v3485_v0  ;;  %v1352_v19 = vrot.slane %v1344_v14, %v3831_v39  ;;  %v1359_v20 = vrot.slane %v1345_v15, %v3831_v39  ;;  %v1136_v14 = vpop.permute.xlu1 %1135  ;;  %v1133_v15 = vpop.permute.xlu0 %1132 }
 0x22b   : > { %3035 = vmatprep.subr.bf16.mxu0 %v3485_v0  ;;  %3020 = vmatmul.mubr.msk.bf16.vlgmr.msra.gmra.mrb[12].mxu1 %vm1456_vm3, %v1436_v44  ;;  %v1384_v21 = vrot.slane %v1376_v16, %v3831_v39  ;;  %v1391_v22 = vrot.slane %v1377_v17, %v3831_v39 }
 0x22c   : > { %3030 = vmatpush3.bf16.xpose.msra.mxu1 %v1737_v46  ;;  %3031 = vmatprep.mubr.msk.bf16.mxu1 %vm3486_vm0, %v3485_v0 }
 0x22d   : > { %3041 = vmatprep.subr.bf16.mxu1 %v3485_v0  ;;  %v1408_v23 = vcombine.low %v1352_v19, %v1384_v21  ;;  %v1409_v24 = vcombine.high %v1352_v19, %v1384_v21  ;;  %v1410_v25 = vcombine.low %v1359_v20, %v1391_v22  ;;  %v1411_v26 = vcombine.high %v1359_v20, %v1391_v22 }
 0x22f   : > { %v1416_v27 = vpack.c.bf16 %v1408_v23, %v1408_v23  ;;  %v1417_v28 = vpack.c.bf16 %v1409_v24, %v1409_v24  ;;  %v1418_v29 = vpack.c.bf16 %v1410_v25, %v1410_v25  ;;  %v1419_v30 = vpack.c.bf16 %v1411_v26, %v1411_v26 }
 0x231   : > { %3026 = vmatmul.mubr.msk.bf16.vlgmr.msra.gmra.mrb[16].mxu0 %vm1456_vm3, %v1437_v45  ;;  %1424 = vst.msk [vmem:[#allocation4] sm:$0xf] %vm803_vm2, %v1416_v27  ;;  %1425 = vst.msk [vmem:[#allocation4 + $0x4] sm:$0xf] %vm803_vm2, %v1417_v28 }
 0x232   : > { %3036 = vmatpush3.bf16.xpose.msra.mxu0 %v1783_v47  ;;  %3037 = vmatprep.mubr.msk.bf16.mxu0 %vm3486_vm0, %v3485_v0  ;;  %1426 = vst.msk [vmem:[#allocation4 + $0x8] sm:$0xf] %vm803_vm2, %v1418_v29  ;;  %1427 = vst.msk [vmem:[#allocation4 + $0xc] sm:$0xf] %vm803_vm2, %v1419_v30 }
 0x233   : > { %3047 = vmatprep.subr.bf16.mxu0 %v3485_v0  ;;  %3032 = vmatmul.mubr.msk.bf16.vlgmr.msra.gmra.mrb[16].mxu1 %vm1456_vm3, %v1438_v48 }
 0x234   : > { %3043 = vmatprep.mubr.msk.bf16.mxu1 %vm3486_vm0, %v3485_v0 }
 0x238   : > { %v1448_v31 = vld [vmem:[#allocation4] sm:$0xf]  ;;  %v1449_v33 = vld [vmem:[#allocation4 + $0x4] sm:$0xf] }
 0x239   : > { %3038 = vmatmul.mubr.msk.bf16.vlgmr.msra.gmra.mrb[20].mxu0 %vm1456_vm3, %v1439_v49  ;;  %v1951_v34 = vsel %vm1949_vm4, %v1448_v31, 0  ;;  %v1997_v35 = vsel %vm1949_vm4, %v1449_v33, 0 }
 0x23a   : > { %3049 = vmatprep.mubr.msk.bf16.mxu0 %vm3486_vm0, %v3485_v0  ;;  %3042 = vmatpush3.bf16.msra.mxu1 %v1951_v34 }
 0x23b   : > { %3048 = vmatpush3.bf16.msra.mxu0 %v1997_v35  ;;  %3053 = vmatprep.subr.bf16.mxu1 %v3485_v0 }
 0x23c   : > { %3059 = vmatprep.subr.bf16.mxu0 %v3485_v0 }
 0x2e7   : > { %v1497_v36 = vpop.f32.mrb[4].mxu1 }
 0x2e8   : > { %v2997_v38 = vpop.f32.mrb[5].mxu1  ;;  %v1826_v40 = vsel %vm1825_vm5, %v1497_v36, -inf }
 0x2e9   : > { %v1500_v42 = vpop.f32.mrb[6].mxu1  ;;  %1827 = vmax.xlane.f32.xlu1 %v1826_v40 }
 0x2ea   : > { %v2998_v45 = vpop.f32.mrb[7].mxu1 }
 0x2f4   : > { %v1543_v37 = vpop.f32.mrb[8].mxu0 }
 0x2f5   : > { %v3003_v41 = vpop.f32.mrb[9].mxu0  ;;  %v1829_v43 = vsel %vm1825_vm5, %v1543_v37, -inf }
 0x2f6   : > { %1830 = vmax.xlane.f32.xlu0 %v1829_v43  ;;  %v1546_v44 = vpop.f32.mrb[10].mxu0  ;;  %v1589_v47 = vpop.f32.mrb[8].mxu1  ;;  %v1450_v41 = vld [vmem:[#allocation4 + $0x8] sm:$0xf] }
 0x2f7   : > { %v3004_v46 = vpop.f32.mrb[11].mxu0  ;;  %v3009_v49 = vpop.f32.mrb[9].mxu1  ;;  %v1832_v50 = vsel %vm1825_vm5, %v1589_v47, -inf }
 0x2f8   : > { %v1592_v52 = vpop.f32.mrb[10].mxu1  ;;  %v1451_v49 = vld [vmem:[#allocation4 + $0xc] sm:$0xf] }
 0x2f9   : > { %v3010_v55 = vpop.f32.mrb[11].mxu1  ;;  %v2043_v52 = vsel %vm1949_vm4, %v1450_v41, 0 }
 0x2fa   : > { %1833 = vmax.xlane.f32.xlu0 %v1832_v50 }
 0x2fc   : > { %v1635_v48 = vpop.f32.mrb[12].mxu0 }
 0x2fd   : > { %v3015_v51 = vpop.f32.mrb[13].mxu0  ;;  %v1835_v53 = vsel %vm1825_vm5, %v1635_v48, -inf }
 0x2fe   : > { %1836 = vmax.xlane.f32.xlu1 %v1835_v53  ;;  %v1638_v54 = vpop.f32.mrb[14].mxu0  ;;  %v3993_v57 = vpop.f32.mrb[12].mxu1 }
 0x2ff   : > { %v3016_v56 = vpop.f32.mrb[15].mxu0  ;;  %v3021_v59 = vpop.f32.mrb[13].mxu1  ;;  %v1838_v12 = vsel %vm1825_vm5, %v3993_v57, -inf }
 0x300   : > { %v1684_v61 = vpop.f32.mrb[14].mxu1  ;;  %v2089_v59 = vsel %vm1949_vm4, %v1451_v49, 0 }
 0x301   : > { %v3022_v2 = vpop.f32.mrb[15].mxu1 }
 0x304   : > { %v3995_v58 = vpop.f32.mrb[16].mxu0 }
 0x305   : > { %v3027_v60 = vpop.f32.mrb[17].mxu0  ;;  %v1841_v11 = vsel %vm1825_vm5, %v3995_v58, -inf }
 0x306   : > { %v1730_v1 = vpop.f32.mrb[18].mxu0  ;;  %v3997_v4 = vpop.f32.mrb[16].mxu1 }
 0x307   : > { %v3028_v3 = vpop.f32.mrb[19].mxu0  ;;  %v3033_v6 = vpop.f32.mrb[17].mxu1  ;;  %v1844_v63 = vsel %vm1825_vm5, %v3997_v4, -inf }
 0x308   : > { %v1776_v8 = vpop.f32.mrb[18].mxu1 }
 0x309   : > { %v3034_v62 = vpop.f32.mrb[19].mxu1 }
 0x30c   : > { %v3999_v5 = vpop.f32.mrb[20].mxu0 }
 0x30d   : > { %v3039_v7 = vpop.f32.mrb[21].mxu0  ;;  %v1847_v13 = vsel %vm1825_vm5, %v3999_v5, -inf }
 0x30e   : > { %v1822_v9 = vpop.f32.mrb[22].mxu0 }
 0x30f   : > { %1138 = vrot.lane.b32.xlu1 %v3821_v18, %s3492_s7  ;;  %v3040_v10 = vpop.f32.mrb[23].mxu0  ;;  %s2736_s7 = sshll.u32 %s324_s30, 4  ;;  %s4168_s7 = int_to_ptr.vmem [resolvable:$true] %s2736_s7 }
 0x310   : > { %1141 = vrot.lane.b32.xlu0 %v3821_v18, %s3493_s10  ;;  %s3402_s29 = scalar_lea.vmem %s4168_s7, 128 }
 0x311   : > { %p3403_p6 = scmp.ne.s32.totalorder %s4168_s7, %s3402_s29 }
 0x313   : > { %p3404_p7 = pnand %p3403_p6, %p4235_p5 }
 0x315   : > { %p3405_p9 = pneg %p3404_p7 }
 0x32f   : > { %1842 = vmax.xlane.f32.xlu0 %v1841_v11 }
 0x333   : > { %1839 = vmax.xlane.f32.xlu1 %v1838_v12  ;;  %1845 = vmax.xlane.f32.xlu0 %v1844_v63 }
 0x337   : > { %1848 = vmax.xlane.f32.xlu1 %v1847_v13 }
 0x376   : > { %v4013_v16 = vpop.xlane.xlu1 %1827 }
 0x377   : > { %v1874_v18 = vsub.f32 %v1497_v36, %v4013_v16 }
 0x379   : > { %v1882_v20 = vmul.f32 1.442695, %v1874_v18 }
 0x37b   : > { %3212 = vpow2.f32 %v1882_v20 }
 0x383   : > { %v4016_v17 = vpop.xlane.xlu0 %1830 }
 0x384   : > { %v1875_v19 = vsub.f32 %v1543_v37, %v4016_v17 }
 0x385   : > { %v3213_v37 = vpop.eup %3212 }
 0x386   : > { %v1884_v21 = vmul.f32 1.442695, %v1875_v19  ;;  %v1906_v42 = vsel %vm1825_vm5, %v3213_v37, 0.0  ;;  %v1938_v43 = vpack.c.bf16 %v3213_v37, %v3213_v37 }
 0x387   : > { %v4019_v22 = vpop.xlane.xlu0 %1833  ;;  %1907 = vadd.xlane.f32.xlu0 %v1906_v42 }
 0x388   : > { %3214 = vpow2.f32 %v1884_v21  ;;  %v1876_v23 = vsub.f32 %v1589_v47, %v4019_v22  ;;  %3044 = vmatmul.mubr.msk.bf16.vlgmr.msra.gmra.mrb[20].mxu1 %vm1825_vm5, %v1938_v43 }
 0x389   : > { %3054 = vmatpush3.bf16.msra.mxu1 %v2043_v52  ;;  %3055 = vmatprep.mubr.msk.bf16.mxu1 %vm3486_vm0, %v3485_v0 }
 0x38a   : > { %v1886_v26 = vmul.f32 1.442695, %v1876_v23  ;;  %3065 = vmatprep.subr.bf16.mxu1 %v3485_v0 }
 0x38b   : > { %v4022_v24 = vpop.xlane.xlu1 %1836  ;;  %v1142_v28 = vpop.permute.xlu0 %1141 }
 0x38c   : > { %v1877_v25 = vsub.f32 %v1635_v48, %v4022_v24  ;;  %v1192_v29 = vcombine.low %v1136_v14, %v1142_v28  ;;  %v1193_v30 = vcombine.high %v1136_v14, %v1142_v28  ;;  %3216 = vpow2.f32 %v1886_v26 }
 0x38e   : > { %v1888_v27 = vmul.f32 1.442695, %v1877_v25  ;;  %v1200_v35 = vrot.slane %v1192_v29, %v3829_v32  ;;  %v1207_v36 = vrot.slane %v1193_v30, %v3829_v32 }
 0x38f   : > { %v1139_v31 = vpop.permute.xlu1 %1138 }
 0x390   : > { %v1176_v33 = vcombine.low %v1133_v15, %v1139_v31  ;;  %v1177_v34 = vcombine.high %v1133_v15, %v1139_v31  ;;  %3218 = vpow2.f32 %v1888_v27 }
 0x392   : > { %v1184_v38 = vrot.slane %v1176_v33, %v3829_v32  ;;  %v1191_v40 = vrot.slane %v1177_v34, %v3829_v32  ;;  %v3215_v44 = vpop.eup %3214 }
 0x393   : > { %v1909_v50 = vsel %vm1825_vm5, %v3215_v44, 0.0  ;;  %v1939_v51 = vpack.c.bf16 %v3215_v44, %v3215_v44 }
 0x394   : > { %v1240_v45 = vcombine.low %v1184_v38, %v1200_v35  ;;  %v1241_v46 = vcombine.high %v1184_v38, %v1200_v35  ;;  %v1256_v47 = vcombine.low %v1191_v40, %v1207_v36  ;;  %v1257_v48 = vcombine.high %v1191_v40, %v1207_v36  ;;  %1910 = vadd.xlane.f32.xlu1 %v1909_v50 }
 0x395   : > { %3050 = vmatmul.mubr.msk.bf16.vlgmr.msra.gmra.mrb[24].mxu0 %vm1825_vm5, %v1939_v51 }
 0x396   : > { %v1248_v53 = vrot.slane %v1240_v45, %v3831_v39  ;;  %v1255_v54 = vrot.slane %v1241_v46, %v3831_v39  ;;  %v1264_v55 = vrot.slane %v1256_v47, %v3831_v39  ;;  %v1271_v56 = vrot.slane %v1257_v48, %v3831_v39  ;;  %3060 = vmatpush3.bf16.msra.mxu0 %v2089_v59  ;;  %v3217_v3 = vpop.eup %3216 }
 0x397   : > { %3061 = vmatprep.mubr.msk.bf16.mxu0 %vm3486_vm0, %v3485_v0  ;;  %v1912_v62 = vsel %vm1825_vm5, %v3217_v3, 0.0  ;;  %v1940_v10 = vpack.c.bf16 %v3217_v3, %v3217_v3  ;;  %3071 = vmatprep.subr.bf16.mxu0 %v3485_v0 }
 0x398   : > { %v2886_v60 = vcombine.low %v1248_v53, %v1255_v54  ;;  %v2888_v61 = vcombine.high %v1248_v53, %v1255_v54  ;;  %v2890_v1 = vcombine.low %v1264_v55, %v1271_v56  ;;  %v2892_v2 = vcombine.high %v1264_v55, %v1271_v56  ;;  %1913 = vadd.xlane.f32.xlu0 %v1912_v62 }
 0x399   : > { %3056 = vmatmul.mubr.msk.bf16.vlgmr.msra.gmra.mrb[24].mxu1 %vm1825_vm5, %v1940_v10  ;;  %v1852_v62 = vsub.f32 -inf, %v4019_v22  ;;  %v1853_v10 = vsub.f32 -inf, %v4022_v24 }
 0x39a   : > { %v1295_v6 = vrot.slane %v2886_v60, %v3829_v32  ;;  %v1311_v7 = vrot.slane %v2888_v61, %v3829_v32  ;;  %v1327_v8 = vrot.slane %v2890_v1, %v3829_v32  ;;  %v1343_v9 = vrot.slane %v2892_v2, %v3829_v32  ;;  %v3219_v11 = vpop.eup %3218  ;;  %3067 = vmatprep.mubr.msk.bf16.mxu1 %vm3486_vm0, %v3485_v0 }
 0x39b   : > { %v1915_v15 = vsel %vm1825_vm5, %v3219_v11, 0.0  ;;  %v1941_v18 = vpack.c.bf16 %v3219_v11, %v3219_v11  ;;  %v1862_v11 = vmul.f32 1.442695, %v1852_v62 }
 0x39c   : > { %v1360_v12 = vcombine.low %v1295_v6, %v1311_v7  ;;  %v1361_v63 = vcombine.high %v1295_v6, %v1311_v7  ;;  %v1392_v13 = vcombine.low %v1327_v8, %v1343_v9  ;;  %v1393_v14 = vcombine.high %v1327_v8, %v1343_v9  ;;  %1916 = vadd.xlane.f32.xlu1 %v1915_v15 }
 0x39d   : > { %3062 = vmatmul.mubr.msk.bf16.vlgmr.msra.gmra.mrb[28].mxu0 %vm1825_vm5, %v1941_v18  ;;  %v1850_v6 = vsub.f32 -inf, %v4013_v16  ;;  %v1851_v7 = vsub.f32 -inf, %v4016_v17 }
 0x39e   : > { %v1368_v19 = vrot.slane %v1360_v12, %v3831_v39  ;;  %v1375_v20 = vrot.slane %v1361_v63, %v3831_v39  ;;  %v1400_v21 = vrot.slane %v1392_v13, %v3831_v39  ;;  %v1407_v23 = vrot.slane %v1393_v14, %v3831_v39  ;;  %3073 = vmatprep.mubr.msk.bf16.mxu0 %vm3486_vm0, %v3485_v0 }
 0x39f   : > { %v1858_v8 = vmul.f32 1.442695, %v1850_v6  ;;  %v1860_v9 = vmul.f32 1.442695, %v1851_v7  ;;  %v1864_v12 = vmul.f32 1.442695, %v1853_v10 }
 0x3a0   : > { %v1412_v25 = vcombine.low %v1368_v19, %v1400_v21  ;;  %v1413_v26 = vcombine.high %v1368_v19, %v1400_v21  ;;  %v1414_v27 = vcombine.low %v1375_v20, %v1407_v23  ;;  %v1415_v28 = vcombine.high %v1375_v20, %v1407_v23 }
 0x3a2   : > { %v1420_v29 = vpack.c.bf16 %v1412_v25, %v1412_v25  ;;  %v1421_v30 = vpack.c.bf16 %v1413_v26, %v1413_v26  ;;  %v1422_v31 = vpack.c.bf16 %v1414_v27, %v1414_v27  ;;  %v1423_v33 = vpack.c.bf16 %v1415_v28, %v1415_v28 }
 0x3a4   : > { %1428 = vst.msk [vmem:[#allocation4 + $0x10] sm:$0xf] %vm803_vm2, %v1420_v29  ;;  %1429 = vst.msk [vmem:[#allocation4 + $0x14] sm:$0xf] %vm803_vm2, %v1421_v30 }
 0x3a5   : > { %1430 = vst.msk [vmem:[#allocation4 + $0x18] sm:$0xf] %vm803_vm2, %v1422_v31  ;;  %1431 = vst.msk [vmem:[#allocation4 + $0x1c] sm:$0xf] %vm803_vm2, %v1423_v33 }
 0x3ab   : > { %v1452_v34 = vld [vmem:[#allocation4 + $0x10] sm:$0xf]  ;;  %v1453_v35 = vld [vmem:[#allocation4 + $0x14] sm:$0xf] }
 0x3ac   : > { %v2135_v36 = vsel %vm1949_vm4, %v1452_v34, 0  ;;  %v2181_v37 = vsel %vm1949_vm4, %v1453_v35, 0  ;;  %v1455_v54 = vld [vmem:[#allocation4 + $0x1c] sm:$0xf] }
 0x3ad   : > { %3066 = vmatpush3.bf16.msra.mxu1 %v2135_v36  ;;  %3072 = vmatpush3.bf16.msra.mxu0 %v2181_v37  ;;  %v2273_v59 = vsel %vm1949_vm4, %v1455_v54, 0 }
 0x3ae   : > { %3077 = vmatprep.subr.bf16.mxu1 %v3485_v0  ;;  %3083 = vmatprep.subr.bf16.mxu0 %v3485_v0 }
 0x3bc   : > { %v4069_v38 = vpop.xlane.xlu0 %1842 }
 0x3bd   : > { %v1879_v41 = vsub.f32 %v3995_v58, %v4069_v38 }
 0x3bf   : > { %v1892_v44 = vmul.f32 1.442695, %v1879_v41 }
 0x3c0   : > { %v4071_v40 = vpop.xlane.xlu1 %1839  ;;  %v4077_v45 = vpop.xlane.xlu0 %1845 }
 0x3c1   : > { %v1878_v42 = vsub.f32 %v3993_v57, %v4071_v40  ;;  %v1880_v46 = vsub.f32 %v3997_v4, %v4077_v45  ;;  %v1454_v57 = vld [vmem:[#allocation4 + $0x18] sm:$0xf] }
 0x3c3   : > { %v1890_v43 = vmul.f32 1.442695, %v1878_v42  ;;  %v1894_v49 = vmul.f32 1.442695, %v1880_v46 }
 0x3c4   : > { %v4081_v47 = vpop.xlane.xlu1 %1848 }
 0x3c5   : > { %v1881_v48 = vsub.f32 %v3999_v5, %v4081_v47  ;;  %3220 = vpow2.f32 %v1890_v43  ;;  %v2227_v5 = vsel %vm1949_vm4, %v1454_v57, 0 }
 0x3c6   : > { %3222 = vpow2.f32 %v1892_v44 }
 0x3c7   : > { %v1896_v50 = vmul.f32 1.442695, %v1881_v48  ;;  %3224 = vpow2.f32 %v1894_v49 }
 0x3c9   : > { %3226 = vpow2.f32 %v1896_v50 }
 0x3ca   : > { %3228 = vpow2.f32 %v1858_v8 }
 0x3cb   : > { %3230 = vpow2.f32 %v1860_v9 }
 0x3cc   : > { %3232 = vpow2.f32 %v1862_v11 }
 0x3cd   : > { %3234 = vpow2.f32 %v1864_v12 }
 0x3cf   : > { %v3221_v58 = vpop.eup %3220 }
 0x3d0   : > { %v3223_v51 = vpop.eup %3222  ;;  %v1918_v52 = vsel %vm1825_vm5, %v3221_v58, 0.0  ;;  %v1942_v53 = vpack.c.bf16 %v3221_v58, %v3221_v58 }
 0x3d1   : > { %1919 = vadd.xlane.f32.xlu0 %v1918_v52  ;;  %v1921_v4 = vsel %vm1825_vm5, %v3223_v51, 0.0  ;;  %v1943_v55 = vpack.c.bf16 %v3223_v51, %v3223_v51  ;;  %v3225_v56 = vpop.eup %3224 }
 0x3d2   : > { %1922 = vadd.xlane.f32.xlu1 %v1921_v4  ;;  %3068 = vmatmul.mubr.msk.bf16.vlgmr.msra.gmra.mrb[28].mxu1 %vm1825_vm5, %v1942_v53  ;;  %v1924_v60 = vsel %vm1825_vm5, %v3225_v56, 0.0  ;;  %v1944_v2 = vpack.c.bf16 %v3225_v56, %v3225_v56 }
 0x3d3   : > { %3074 = vmatmul.mubr.msk.bf16.vlgmr.msra.gmra.mrb[32].mxu0 %vm1825_vm5, %v1943_v55  ;;  %3078 = vmatpush3.bf16.msra.mxu1 %v2227_v5  ;;  %v3227_v61 = vpop.eup %3226 }
 0x3d4   : > { %3084 = vmatpush3.bf16.msra.mxu0 %v2273_v59  ;;  %3079 = vmatprep.mubr.msk.bf16.mxu1 %vm3486_vm0, %v3485_v0  ;;  %v1927_v1 = vsel %vm1825_vm5, %v3227_v61, 0.0  ;;  %v1945_v3 = vpack.c.bf16 %v3227_v61, %v3227_v61  ;;  %v3229_v63 = vpop.eup %3228 }
 0x3d5   : > { %1925 = vadd.xlane.f32.xlu0 %v1924_v60  ;;  %3085 = vmatprep.mubr.msk.bf16.mxu0 %vm3486_vm0, %v3485_v0  ;;  %v3231_v13 = vpop.eup %3230  ;;  %v1898_v15 = vmul.f32 0.0, %v3229_v63 }
 0x3d6   : > { %1928 = vadd.xlane.f32.xlu1 %v1927_v1  ;;  %3089 = vmatprep.subr.bf16.mxu1 %v3485_v0  ;;  %v1899_v19 = vmul.f32 0.0, %v3231_v13  ;;  %v3233_v20 = vpop.eup %3232 }
 0x3d7   : > { %v3235_v21 = vpop.eup %3234  ;;  %v1900_v22 = vmul.f32 0.0, %v3233_v20 }
 0x3d8   : > { %v1901_v26 = vmul.f32 0.0, %v3235_v21 }
 0x3da   : > { %3080 = vmatmul.mubr.msk.bf16.vlgmr.msra.gmra.mrb[32].mxu1 %vm1825_vm5, %v1944_v2 }
 0x3db   : > { %3086 = vmatmul.mubr.msk.bf16.vlgmr.msra.gmra.mrb[36].mxu0 %vm1825_vm5, %v1945_v3  ;;  %3093 = vmatprep.mubr.msk.bf16.mxu1 %vm3486_vm0, %v3485_v0 }
 0x414   : > { %v1908_v14 = vpop.xlane.xlu0 %1907 }
 0x415   : > { %v1930_v16 = vadd.f32 %v1908_v14, %v1898_v15 }
 0x417   : > { %3236 = vrcp.f32 %v1930_v16 }
 0x421   : > { %v1911_v18 = vpop.xlane.xlu1 %1910  ;;  %v3237_v31 = vpop.eup %3236 }
 0x422   : > { %v1931_v17 = vadd.f32 %v1911_v18, %v1899_v19 }
 0x424   : > { %3238 = vrcp.f32 %v1931_v17 }
 0x425   : > { %v1914_v23 = vpop.xlane.xlu0 %1913 }
 0x426   : > { %v1932_v24 = vadd.f32 %v1914_v23, %v1900_v22 }
 0x428   : > { %3240 = vrcp.f32 %v1932_v24 }
 0x429   : > { %v1917_v25 = vpop.xlane.xlu1 %1916 }
 0x42a   : > { %v1933_v27 = vadd.f32 %v1917_v25, %v1901_v26 }
 0x42c   : > { %3242 = vrcp.f32 %v1933_v27 }
 0x42e   : > { %v3239_v42 = vpop.eup %3238 }
 0x432   : > { %v3241_v58 = vpop.eup %3240 }
 0x436   : > { %v3243_v55 = vpop.eup %3242 }
 0x45b   : > { %v1987_v28 = vpop.f32.mrb[20].mxu1 }
 0x45c   : > { %v2315_v29 = vadd.f32 %v1987_v28, %v1898_v15  ;;  %v3045_v30 = vpop.f32.mrb[21].mxu1  ;;  %v1855_v28 = vsub.f32 -inf, %v4069_v38 }
 0x45d   : > { %v1990_v34 = vpop.f32.mrb[22].mxu1 }
 0x45e   : > { %v2331_v35 = vmul.f32 %v3237_v31, %v2315_v29  ;;  %v3046_v41 = vpop.f32.mrb[23].mxu1  ;;  %v1868_v38 = vmul.f32 1.442695, %v1855_v28 }
 0x45f   : > { %v1856_v41 = vsub.f32 -inf, %v4077_v45 }
 0x468   : > { %v2033_v33 = vpop.f32.mrb[24].mxu0 }
 0x469   : > { %v2316_v36 = vadd.f32 %v2033_v33, %v1899_v19  ;;  %v3051_v37 = vpop.f32.mrb[25].mxu0 }
 0x46a   : > { %v2036_v43 = vpop.f32.mrb[26].mxu0 }
 0x46b   : > { %v2332_v44 = vmul.f32 %v3239_v42, %v2316_v36  ;;  %v3052_v46 = vpop.f32.mrb[27].mxu0  ;;  %v1857_v42 = vsub.f32 -inf, %v4081_v47  ;;  %v1870_v43 = vmul.f32 1.442695, %v1856_v41 }
 0x46c   : > { %v2079_v48 = vpop.f32.mrb[24].mxu1 }
 0x46d   : > { %v2317_v49 = vadd.f32 %v2079_v48, %v1900_v22  ;;  %v3057_v50 = vpop.f32.mrb[25].mxu1  ;;  %v1854_v22 = vsub.f32 -inf, %v4071_v40 }
 0x46e   : > { %v2082_v51 = vpop.f32.mrb[26].mxu1 }
 0x46f   : > { %v2333_v52 = vmul.f32 %v3241_v58, %v2317_v49  ;;  %v3058_v4 = vpop.f32.mrb[27].mxu1  ;;  %v1866_v34 = vmul.f32 1.442695, %v1854_v22  ;;  %v1920_v49 = vpop.xlane.xlu0 %1919 }
 0x470   : > { %v2125_v57 = vpop.f32.mrb[28].mxu0  ;;  %v1923_v58 = vpop.xlane.xlu1 %1922 }
 0x471   : > { %v2318_v53 = vadd.f32 %v2125_v57, %v1901_v26  ;;  %v3063_v54 = vpop.f32.mrb[29].mxu0  ;;  %v2339_v5 = vcombine.low %v2331_v35, %v2333_v52  ;;  %v2340_v59 = vcombine.high %v2331_v35, %v2333_v52  ;;  %3244 = vpow2.f32 %v1866_v34 }
 0x472   : > { %v2128_v56 = vpop.f32.mrb[30].mxu0  ;;  %3246 = vpow2.f32 %v1868_v38 }
 0x473   : > { %v2334_v60 = vmul.f32 %v3243_v55, %v2318_v53  ;;  %v3064_v61 = vpop.f32.mrb[31].mxu0  ;;  %v2347_v1 = vrot.slane %v2339_v5, %v3829_v32  ;;  %v2354_v2 = vrot.slane %v2340_v59, %v3829_v32  ;;  %3248 = vpow2.f32 %v1870_v43  ;;  %v1926_v45 = vpop.xlane.xlu0 %1925 }
 0x474   : > { %v1929_v4 = vpop.xlane.xlu1 %1928 }
 0x475   : > { %v2355_v3 = vcombine.low %v2332_v44, %v2334_v60  ;;  %v2356_v6 = vcombine.high %v2332_v44, %v2334_v60  ;;  %v1872_v44 = vmul.f32 1.442695, %v1857_v42 }
 0x477   : > { %v2363_v7 = vrot.slane %v2355_v3, %v3829_v32  ;;  %v2370_v8 = vrot.slane %v2356_v6, %v3829_v32  ;;  %3250 = vpow2.f32 %v1872_v44 }
 0x479   : > { %v2403_v9 = vcombine.low %v2347_v1, %v2363_v7  ;;  %v2404_v62 = vcombine.high %v2347_v1, %v2363_v7  ;;  %v2419_v10 = vcombine.low %v2354_v2, %v2370_v8  ;;  %v2420_v11 = vcombine.high %v2354_v2, %v2370_v8 }
 0x47b   : > { %v2411_v12 = vrot.slane %v2403_v9, %v3831_v39  ;;  %v2418_v63 = vrot.slane %v2404_v62, %v3831_v39  ;;  %v2427_v13 = vrot.slane %v2419_v10, %v3831_v39  ;;  %v2434_v14 = vrot.slane %v2420_v11, %v3831_v39  ;;  %v3245_v46 = vpop.eup %3244 }
 0x47c   : > { %v3247_v48 = vpop.eup %3246  ;;  %v1902_v50 = vmul.f32 0.0, %v3245_v46 }
 0x47d   : > { %v2909_v15 = vcombine.low %v2411_v12, %v2418_v63  ;;  %v2911_v18 = vcombine.high %v2411_v12, %v2418_v63  ;;  %v2913_v16 = vcombine.low %v2427_v13, %v2434_v14  ;;  %v2915_v19 = vcombine.high %v2427_v13, %v2434_v14  ;;  %v3249_v53 = vpop.eup %3248 }
 0x47e   : > { %v1903_v57 = vmul.f32 0.0, %v3247_v48  ;;  %v1934_v51 = vadd.f32 %v1920_v49, %v1902_v50  ;;  %v1904_v47 = vmul.f32 0.0, %v3249_v53 }
 0x47f   : > { %v2483_v17 = vrot.slane %v2909_v15, %v3829_v32  ;;  %v2499_v20 = vrot.slane %v2911_v18, %v3829_v32  ;;  %v2515_v21 = vrot.slane %v2913_v16, %v3829_v32  ;;  %v2531_v23 = vrot.slane %v2915_v19, %v3829_v32 }
 0x480   : > { %v1935_v52 = vadd.f32 %v1923_v58, %v1903_v57  ;;  %3252 = vrcp.f32 %v1934_v51  ;;  %v1936_v56 = vadd.f32 %v1926_v45, %v1904_v47 }
 0x481   : > { %v2540_v25 = vcombine.high %v2483_v17, %v2499_v20  ;;  %v2572_v24 = vcombine.high %v2515_v21, %v2531_v23  ;;  %v2539_v26 = vcombine.low %v2483_v17, %v2499_v20  ;;  %v2571_v27 = vcombine.low %v2515_v21, %v2531_v23  ;;  %v3251_v54 = vpop.eup %3250 }
 0x482   : > { %3254 = vrcp.f32 %v1935_v52  ;;  %v1905_v55 = vmul.f32 0.0, %v3251_v54 }
 0x483   : > { %v2554_v29 = vrot.slane %v2540_v25, %v3831_v39  ;;  %v2586_v30 = vrot.slane %v2572_v24, %v3831_v39  ;;  %v4123_v31 = vrot.slane %v2539_v26, %v3831_v39  ;;  %v4126_v33 = vrot.slane %v2571_v27, %v3831_v39 }
 0x484   : > { %v1937_v5 = vadd.f32 %v1929_v4, %v1905_v55  ;;  %3256 = vrcp.f32 %v1936_v56  ;;  %v3210_v56 = vld [vmem:[#allocation14] sm:$0xff]  }
 0x485   : > { %v2605_v35 = vcombine.low %v2554_v29, %v2586_v30  ;;  %v2604_v40 = vcombine.high %v4123_v31, %v4126_v33  ;;  %v2606_v36 = vcombine.high %v2554_v29, %v2586_v30  ;;  %v2603_v37 = vcombine.low %v4123_v31, %v4126_v33  ;;  %3090 = vmatpush3.bf16.msra.mxu1 %v3210_v56 }
 0x486   : > { %3258 = vrcp.f32 %v1937_v5  ;;  %3091 = vmatprep.subr.bf16.mxu1 %v3485_v0 }
 0x487   : > { %2616 = vrot.lane.b32.xlu1 %v2605_v35, %s3496_s20  ;;  %2612 = vrot.lane.b32.xlu0 %v2604_v40, %s3497_s11  ;;  %s4166_s11 = scalar_lea.hbm %s4217_s6, %s2922_s13 }
 0x48a   : > { %v3253_v2 = vpop.eup %3252 }
 0x48b   : > { %2620 = vrot.lane.b32.xlu1 %v2606_v36, %s3498_s9  ;;  %s3503_s9 = smov [#allocation15]  }
 0x48c   : > { %v3255_v8 = vpop.eup %3254 }
 0x48e   : > { %v3257_v18 = vpop.eup %3256 }
 0x490   : > { %v3259_v20 = vpop.eup %3258 }
 0x4a5   : > { %v2171_v59 = vpop.f32.mrb[28].mxu1 }
 0x4a6   : > { %v2319_v60 = vadd.f32 %v2171_v59, %v1902_v50  ;;  %v2217_v61 = vpop.f32.mrb[32].mxu0  ;;  %v3069_v1 = vpop.f32.mrb[29].mxu1 }
 0x4a7   : > { %v2320_v3 = vadd.f32 %v2217_v61, %v1903_v57  ;;  %v3075_v6 = vpop.f32.mrb[33].mxu0  ;;  %v2174_v7 = vpop.f32.mrb[30].mxu1  ;;  %v3211_v1 = vld [vmem:[#allocation14 + $0x8] sm:$0xff]  }
 0x4a8   : > { %v2335_v9 = vmul.f32 %v3253_v2, %v2319_v60  ;;  %v2220_v62 = vpop.f32.mrb[34].mxu0  ;;  %v3070_v10 = vpop.f32.mrb[31].mxu1  ;;  %3092 = vmatpush3.bf16.msra.mxu1 %v3211_v1 }
 0x4a9   : > { %v2336_v11 = vmul.f32 %v3255_v8, %v2320_v3  ;;  %v3076_v12 = vpop.f32.mrb[35].mxu0 }
 0x4ad   : > { %v2263_v63 = vpop.f32.mrb[32].mxu1 }
 0x4ae   : > { %v2321_v13 = vadd.f32 %v2263_v63, %v1904_v47  ;;  %v2309_v14 = vpop.f32.mrb[36].mxu0  ;;  %v3081_v15 = vpop.f32.mrb[33].mxu1 }
 0x4af   : > { %v2322_v16 = vadd.f32 %v2309_v14, %v1905_v55  ;;  %v3087_v19 = vpop.f32.mrb[37].mxu0  ;;  %v2266_v17 = vpop.f32.mrb[34].mxu1 }
 0x4b0   : > { %v2337_v21 = vmul.f32 %v3257_v18, %v2321_v13  ;;  %v2312_v23 = vpop.f32.mrb[38].mxu0  ;;  %v3082_v22 = vpop.f32.mrb[35].mxu1  ;;  %v2917_v18 = vld [vmem:[%s4216_s5] ss:$0 sm:$0xff] }
 0x4b1   : > { %v2338_v25 = vmul.f32 %v3259_v20, %v2322_v16  ;;  %v3088_v24 = vpop.f32.mrb[39].mxu0 }
 0x4b2   : > { %v2371_v26 = vcombine.low %v2335_v9, %v2337_v21  ;;  %v2372_v27 = vcombine.high %v2335_v9, %v2337_v21 }
 0x4b3   : > { %v2387_v28 = vcombine.low %v2336_v11, %v2338_v25  ;;  %v2388_v29 = vcombine.high %v2336_v11, %v2338_v25 }
 0x4b4   : > { %v2379_v30 = vrot.slane %v2371_v26, %v3829_v32  ;;  %v2386_v34 = vrot.slane %v2372_v27, %v3829_v32 }
 0x4b5   : > { %v2395_v35 = vrot.slane %v2387_v28, %v3829_v32  ;;  %v2402_v40 = vrot.slane %v2388_v29, %v3829_v32 }
 0x4b7   : > { %v2435_v36 = vcombine.low %v2379_v30, %v2395_v35  ;;  %v2436_v38 = vcombine.high %v2379_v30, %v2395_v35  ;;  %v2451_v41 = vcombine.low %v2386_v34, %v2402_v40  ;;  %v2452_v42 = vcombine.high %v2386_v34, %v2402_v40 }
 0x4b9   : > { %v2443_v43 = vrot.slane %v2435_v36, %v3831_v39  ;;  %v2450_v44 = vrot.slane %v2436_v38, %v3831_v39  ;;  %v2459_v46 = vrot.slane %v2451_v41, %v3831_v39  ;;  %v2466_v48 = vrot.slane %v2452_v42, %v3831_v39 }
 0x4bb   : > { %v2910_v49 = vcombine.low %v2443_v43, %v2450_v44  ;;  %v2912_v50 = vcombine.high %v2443_v43, %v2450_v44  ;;  %v2914_v58 = vcombine.low %v2459_v46, %v2466_v48  ;;  %v2916_v57 = vcombine.high %v2459_v46, %v2466_v48 }
 0x4bd   : > { %v2490_v51 = vrot.slane %v2910_v49, %v3829_v32  ;;  %v2506_v52 = vrot.slane %v2912_v50, %v3829_v32  ;;  %v2522_v53 = vrot.slane %v2914_v58, %v3829_v32  ;;  %v2538_v54 = vrot.slane %v2916_v57, %v3829_v32 }
 0x4bf   : > { %v2555_v45 = vcombine.low %v2490_v51, %v2506_v52  ;;  %v2587_v47 = vcombine.low %v2522_v53, %v2538_v54  ;;  %v2556_v4 = vcombine.high %v2490_v51, %v2506_v52  ;;  %v2588_v55 = vcombine.high %v2522_v53, %v2538_v54 }
 0x4c1   : > { %v2563_v5 = vrot.slane %v2555_v45, %v3831_v39  ;;  %v2595_v59 = vrot.slane %v2587_v47, %v3831_v39  ;;  %v2570_v60 = vrot.slane %v2556_v4, %v3831_v39  ;;  %v2602_v61 = vrot.slane %v2588_v55, %v3831_v39 }
 0x4c3   : > { %v2608_v2 = vcombine.high %v2563_v5, %v2595_v59  ;;  %v2607_v3 = vcombine.low %v2563_v5, %v2595_v59  ;;  %v2610_v6 = vcombine.high %v2570_v60, %v2602_v61  ;;  %v2609_v7 = vcombine.low %v2570_v60, %v2602_v61 }
 0x4c5   : > { %2628 = vrot.lane.b32.xlu1 %v2608_v2, %s3499_s16  ;;  %2624 = vrot.lane.b32.xlu0 %v2607_v3, %s3500_s8  ;;  %s3406_s16 = sshll.u32 %s3503_s9, 4  ;;  %s3407_s16 = int_to_ptr.vmem [resolvable:$false] %s3406_s16 }
 0x4c6   : > { %s3408_s8 = scalar_lea.vmem %s3407_s16, 256  ;;  %p3409_p12 = scmp.lt.s32.totalorder %s4168_s7, %s3407_s16 }
 0x4c7   : > { %p3410_p3 = scmp.lt.s32.totalorder %s3408_s8, %s3402_s29 }
 0x4c9   : > { %2636 = vrot.lane.b32.xlu1 %v2610_v6, %s3501_s18  ;;  %2632 = vrot.lane.b32.xlu0 %v2609_v7, %s3502_s28  ;;  %p3411_p13 = por %p3410_p3, %p3409_p12 }
 0x4cb   : > { %p3412_p0 = pnand %p3411_p13, %p3405_p9 }
 0x4f9   : > { %v2617_v32 = vpop.permute.xlu1 %2616  ;;  %v2613_v8 = vpop.permute.xlu0 %2612 }
 0x4fa   : > { %v2639_v39 = vsel %vm1456_vm3, %v2603_v37, %v2613_v8 }
 0x4fb   : > { %v2640_v0 = vsel %vm1825_vm5, %v2639_v39, %v2617_v32 }
 0x4fd   : > { %v2621_v9 = vpop.permute.xlu1 %2620 }
 0x4fe   : > { %v2642_v62 = vsel %vm2641_vm6, %v2640_v0, %v2621_v9 }
 0x537   : > { %v2629_v10 = vpop.permute.xlu1 %2628  ;;  %v2625_v11 = vpop.permute.xlu0 %2624 }
 0x538   : > { %v2644_v12 = vsel %vm2643_vm7, %v2642_v62, %v2625_v11 }
 0x539   : > { %v2646_v13 = vsel %vm2645_vm8, %v2644_v12, %v2629_v10 }
 0x53b   : > { %v2637_v63 = vpop.permute.xlu1 %2636  ;;  %v2633_v14 = vpop.permute.xlu0 %2632 }
 0x53c   : > { %v2648_v31 = vsel %vm2647_vm9, %v2646_v13, %v2633_v14 }
 0x53d   : > { %v2650_v33 = vsel %vm2649_vm10, %v2648_v31, %v2637_v63 }
 0x53e   : > { %v2651_v37 = vpack.c.bf16 %v2650_v33, %v2650_v33 }
 0x540   : > { %2653 = vst.msk [vmem:[#allocation5] sm:$0xf] %vm2652_vm11, %v2651_v37 }
 0x547   : > { %v2654_v15 = vld [vmem:[#allocation5] sm:$0xf] }
 0x548   : > { %3094 = vmatmul.mubr.msk.bf16.vlgmr.msra.gmra.mrb[36].mxu1 %vm344_vm1, %v2654_v15 }
 0x61b   : > { %v2715_v16 = vpop.f32.mrb[36].mxu1 }
 0x61c   : > { %v2716_v19 = vadd.f32 %v2917_v18, %v2715_v16  ;;  %v3095_v17 = vpop.f32.mrb[37].mxu1 }
 0x61d   : > { %v2718_v20 = vpop.f32.mrb[38].mxu1 }
 0x61e   : > { %v3096_v21 = vpop.f32.mrb[39].mxu1  ;;  %2721 = vst.msk [vmem:[%s324_s30] sm:$0xff] %vm344_vm1, %v2716_v19 }
 0x61f   : > { %3415 = shalt.err (!%p3412_p0)
}
 0x620   : > { %s3416_s14 = scalar_lea.hbm %s4166_s11, 128  ;;  %s3420_s19 = scalar_lea.hbm %s4217_s6, 256 }
 0x621   : > { %p3417_p2 = scmp.ne.s32.totalorder %s4166_s11, %s3416_s14  ;;  %p3421_p10 = scmp.lt.u32.totalorder %s4166_s11, %s4217_s6 }
 0x622   : > { %p3422_p11 = scmp.lt.u32.totalorder %s3420_s19, %s3416_s14  ;;  %p3424_p6 = scmp.lt.u32.totalorder %s3416_s14, %s4166_s11 }
 0x623   : > { %p3418_p8 = pnand %p3417_p2, %p4235_p5 }
 0x624   : > { %p3423_p1 = por %p3422_p11, %p3421_p10 }
 0x625   : > { %p3419_p4 = pneg %p3418_p8 }
 0x626   : > { %p3425_p7 = por %p3424_p6, %p3423_p1 }
 0x628   : > { %p3426_p9 = pnand %p3425_p7, %p3419_p4 }
 0x62a   : > { %3429 = shalt.err (!%p3426_p9)
}
 0x62b   : > { %3115 = dma.vmem_to_hbm [thread:$0]  (%p4235_p5), %s4168_s7, 128, %s4166_s11, %s2723_s27  }
 0x62c PF: > { %s2748_s30 = sand.u32 1, %s3464_s21   ;;  %p4236_p12 = scmp.ne.s32.totalorder %s4228_s25, 0 }
 0x62d   : > { %p4237_p3 = scmp.ge.s32.totalorder %s3476_s24, 2  ;;  %s2749_s10 = scalar_lea.sflag [#allocation8], %s2748_s30 }
 0x62f   : > { %p3135_p13 = pnand %p4237_p3, %p4236_p12 }
 0x631   : > { %3459 = dma.done.wait (!%p3135_p13), %s2749_s10, 128  }
 0x632   : > { %3461 = vsyncadd (!%p3135_p13), %s2749_s10, 4294967168  ;;  %p21_p0 = scmp.ge.s32.totalorder %s3691_s15, 4   ;;  %s4238_s21 = smov %s3468_s22 }
 0x633   : > { %s4239_s22 = smov %s3472_s23  ;;  %s4240_s23 = smov %s3702_s26 }
 0x634   : > { %s4241_s24 = smov %s3691_s15  ;;  %23 = sbr.rel (!%p21_p0) target bundleno = 7 (0x7), region = 105 }
 0x63b   :  { %2754 = vsyncpa [#allocation7], 1 }
 0x63c   :  { %2756 = vsyncpa [#allocation7 + $0x1], 1 }
 0x63d   :  { %2757 = vsyncpa [#allocation10], 1 }
 0x63e   :  { %2758 = vsyncpa [#allocation13], 1 }
 0x63f   :  { %2759 = vsyncpa [#allocation8], 1 }
 0x640   :  { %2761 = vsyncpa [#allocation8 + $0x1], 1 }

</bundles_post_ra>
